<compile_context>
chip_gen: v5e
topology: v5e:2x2
jax: 0.10.0
libtpu: 0.0.40
codegen_flags: <defaults>
</compile_context>

<pallas_src>
import functools

import jax
import jax.numpy as jnp
from jax import lax
from jax.experimental import pallas as pl
from jax.experimental.pallas import tpu as pltpu


# dot_general dimension numbers: contract the LAST dim of both operands ("A @ B.T").
_NT_DIMS = (((1,), (1,)), ((), ()))


def _self_attn_kernel(x_ref, wqk_ref, wv_ref, bqk_ref, bv_ref, gamma_ref, o_ref,
                      *, batch_block, ck_pad):
    """Self_Attn for a block of `batch_block` batch elements.

    x_ref    : (bb, C, N)        channel-major flattened feature maps
    wqk_ref  : (2*ck_pad, C)     [Wq ; Wk], each zero-padded to ck_pad rows
    wv_ref   : (C+1, C)          value weight augmented with a zero row
    bqk_ref  : (2*ck_pad, 1)     [bq ; bk], zero-padded
    bv_ref   : (C+1, 1)          value bias augmented with a 1.0 entry -> last
                                 row of V is constant 1 (softmax denominator row)
    gamma_ref: (1, 1)            residual scale
    o_ref    : (bb, C, N)        gamma * attn_out + x (lane dim = N -> dense stores)
    """
    for b in range(batch_block):
        x_cn = x_ref[b]                                               # (C, N) f32
        C = x_cn.shape[0]

        # Fused Q/K projection, channel-major. Zero-padded rows stay exactly 0
        # (weights and biases of the padding are zero), so they add nothing to
        # the energy contraction.
        qk = jnp.dot(wqk_ref[...], x_cn,
                     preferred_element_type=jnp.float32) + bqk_ref[...]  # (2*ck_pad, N)
        q = qk[:ck_pad, :]                                            # (ck_pad, N)
        k = qk[ck_pad:, :]                                            # (ck_pad, N)

        # Value projection, channel-major; last row is identically 1.0 and will
        # yield the softmax denominator from the output matmul.
        v = jnp.dot(wv_ref[...], x_cn,
                    preferred_element_type=jnp.float32) + bv_ref[...]    # (C+1, N)

        # energy[i, j] = sum_c q[c, i] * k[c, j]
        # Tiny (ck_pad, N) transpose on the XLU; bf16 MXU operands, f32 accumulate.
        q_nc = jnp.transpose(q).astype(jnp.bfloat16)                  # (N, ck_pad)
        energy = jnp.dot(q_nc, k.astype(jnp.bfloat16),
                         preferred_element_type=jnp.float32)          # (N, N) f32

        # Numerically-stable unnormalized softmax over keys (lane axis), in f32.
        m = jnp.max(energy, axis=-1, keepdims=True)                   # (N, 1)
        p = jnp.exp(energy - m)                                       # (N, N) f32

        # out_aug[c, i] = sum_j v[c, j] * p[i, j]
        # Row C of out_aug is sum_j p[i, j] == softmax denominator, already in
        # lane-major (1, N) layout -> normalize AFTER the matmul on (C, N).
        out_aug = lax.dot_general(v.astype(jnp.bfloat16), p.astype(jnp.bfloat16),
                                  _NT_DIMS,
                                  preferred_element_type=jnp.float32)  # (C+1, N)
        out_un = out_aug[:C, :]                                       # (C, N)
        denom_row = out_aug[C:, :]                                    # (1, N)

        # gamma folded into the (1, N) scale; reciprocal on the EUP slot.
        scale = gamma_ref[...] * pl.reciprocal(denom_row, approx=True)  # (1, N)

        o_ref[b] = (out_un * scale + x_cn).astype(o_ref.dtype)


def prepare_self_attn_weights(wq, bq, wk, bk, wv, bv, gamma):
    """One-time weight fusion/padding (hoisted out of the per-call forward).

    wq, wk : (C//8, C, 1, 1)    wv : (C, C, 1, 1)
    bq, bk : (C//8,)            bv : (C,)          gamma : scalar / (1,)
    """
    Ck, C = wq.shape[0], wq.shape[1]
    ck_pad = ((Ck + 7) // 8) * 8          # pad query/key channels to a sublane tile

    wqk = jnp.zeros((2 * ck_pad, C), jnp.float32)
    wqk = wqk.at[:Ck].set(wq.reshape(Ck, C).astype(jnp.float32))
    wqk = wqk.at[ck_pad:ck_pad + Ck].set(wk.reshape(Ck, C).astype(jnp.float32))
    bqk = jnp.zeros((2 * ck_pad, 1), jnp.float32)
    bqk = bqk.at[:Ck, 0].set(bq.astype(jnp.float32))
    bqk = bqk.at[ck_pad:ck_pad + Ck, 0].set(bk.astype(jnp.float32))

    # Augment V with a constant ones row: zero weight row + bias 1.0. The extra
    # output row of the V @ P^T matmul is then exactly the softmax denominator.
    wv_aug = jnp.zeros((C + 1, C), jnp.float32)
    wv_aug = wv_aug.at[:C].set(wv.reshape(C, C).astype(jnp.float32))
    bv_aug = jnp.zeros((C + 1, 1), jnp.float32)
    bv_aug = bv_aug.at[:C, 0].set(bv.astype(jnp.float32))
    bv_aug = bv_aug.at[C, 0].set(1.0)

    gamma_arr = jnp.reshape(jnp.asarray(gamma, jnp.float32), (1, 1))
    return dict(wqk=wqk, bqk=bqk, wv=wv_aug, bv=bv_aug, gamma=gamma_arr)


def _default_batch_block(B):
    # v7x has 2 TensorCores/chip: keep a parallel per-batch grid so both work.
    # Single-TC v5e/v6e: collapse the batch grid into one step (~0.35us/step saved).
    try:
        kind = jax.devices()[0].device_kind.lower()
    except Exception:
        kind = ""
    bb = 1 if "v7" in kind else B
    if B % bb != 0:
        bb = 1
    return bb


def self_attn_forward(x, params, *, batch_block=None):
    """Self_Attn forward (with_attn=False path).

    x      : (B, C, W, H) float32
    params : output of prepare_self_attn_weights
    Returns (B, C, W, H) float32.
    """
    B, C, Wd, Hd = x.shape
    N = Wd * Hd
    wqk, bqk = params["wqk"], params["bqk"]
    wv_aug, bv_aug = params["wv"], params["bv"]
    gamma_arr = params["gamma"]
    ck_pad = wqk.shape[0] // 2

    if batch_block is None:
        batch_block = _default_batch_block(B)

    x_cn = x.reshape(B, C, N).astype(jnp.float32)            # free reshape (contiguous)

    kernel = functools.partial(_self_attn_kernel,
                               batch_block=batch_block, ck_pad=ck_pad)

    out_cn = pl.pallas_call(
        kernel,
        out_shape=jax.ShapeDtypeStruct((B, C, N), jnp.float32),
        grid_spec=pltpu.PrefetchScalarGridSpec(
            num_scalar_prefetch=0,
            grid=(B // batch_block,),
            in_specs=[
                pl.BlockSpec((batch_block, C, N), lambda i: (i, 0, 0)),  # x (channel-major)
                pl.BlockSpec((2 * ck_pad, C), lambda i: (0, 0)),         # fused [Wq ; Wk]
                pl.BlockSpec((C + 1, C), lambda i: (0, 0)),              # Wv (+ ones row)
                pl.BlockSpec((2 * ck_pad, 1), lambda i: (0, 0)),         # fused [bq ; bk]
                pl.BlockSpec((C + 1, 1), lambda i: (0, 0)),              # bv (+ 1.0)
                pl.BlockSpec((1, 1), lambda i: (0, 0)),                  # gamma
            ],
            out_specs=pl.BlockSpec((batch_block, C, N), lambda i: (i, 0, 0)),
        ),
        input_output_aliases={0: 0},       # reuse the x buffer for the output
        compiler_params=pltpu.CompilerParams(
            dimension_semantics=("parallel",)),
    )(x_cn, wqk, wv_aug, bqk, bv_aug, gamma_arr)

    return out_cn.reshape(B, C, Wd, Hd)


if __name__ == "__main__":
    # Self_Attn(in_dim=32): in_dim must be divisible by 8 (query/key have C//8
    # channels), so channels=32, spatial=16x16 (N=256), batch=2.
    B, C, Wd, Hd = 2, 32, 16, 16
    Ck = C // 8

    key = jax.random.PRNGKey(0)
    kx, kwq, kbq, kwk, kbk, kwv, kbv = jax.random.split(key, 7)

    x = jax.random.normal(kx, (B, C, Wd, Hd), dtype=jnp.float32)
    sc = 1.0 / (C ** 0.5)
    wq = jax.random.uniform(kwq, (Ck, C, 1, 1), jnp.float32, -sc, sc)
    bq = jax.random.uniform(kbq, (Ck,), jnp.float32, -sc, sc)
    wk = jax.random.uniform(kwk, (Ck, C, 1, 1), jnp.float32, -sc, sc)
    bk = jax.random.uniform(kbk, (Ck,), jnp.float32, -sc, sc)
    wv = jax.random.uniform(kwv, (C, C, 1, 1), jnp.float32, -sc, sc)
    bv = jax.random.uniform(kbv, (C,), jnp.float32, -sc, sc)
    # nn.Parameter(torch.zeros(1)) initializes gamma to 0; use a nonzero value
    # so the test actually exercises the attention path.
    gamma = jnp.full((1,), 0.5, jnp.float32)

    # One-time weight fusion/padding (not re-done on every forward call).
    params = prepare_self_attn_weights(wq, bq, wk, bk, wv, bv, gamma)

    fwd = jax.jit(self_attn_forward)
    out = fwd(x, params)
    jax.block_until_ready(out)

    # ---- pure-JAX reference mirroring the PyTorch forward --------------------
    def reference(x, wq, bq, wk, bk, wv, bv, gamma):
        b_, c_, w_, h_ = x.shape
        n_ = w_ * h_
        xf = x.reshape(b_, c_, n_)
        q = jnp.einsum('oc,bcn->bon', wq.reshape(-1, c_), xf) + bq[None, :, None]
        k = jnp.einsum('oc,bcn->bon', wk.reshape(-1, c_), xf) + bk[None, :, None]
        v = jnp.einsum('oc,bcn->bon', wv.reshape(c_, c_), xf) + bv[None, :, None]
        energy = jnp.einsum('bci,bcj->bij', q, k)          # (B, N, N)
        attn = jax.nn.softmax(energy, axis=-1)
        o = jnp.einsum('bcj,bij->bci', v, attn)            # (B, C, N)
        o = gamma * o + xf
        return o.reshape(b_, c_, w_, h_)

    expected = reference(x, wq, bq, wk, bk, wv, bv, gamma)
    assert out.shape == expected.shape == (B, C, Wd, Hd)
    # tolerance covers bf16 MXU operands (f32 accumulation) and the EUP
    # approximate reciprocal in the softmax normalization
    err = float(jnp.max(jnp.abs(out - expected)))
    assert jnp.allclose(out, expected, atol=5e-2, rtol=5e-2), f"max abs err = {err}"

    print("KERNEL_OK")
</pallas_src>

<mosaic_0001>
module attributes {stable_mosaic.version = 11 : i64} {
  func.func @_self_attn_kernel(%arg0: i32, %arg1: memref<2x32x256xf32, #tpu.memory_space<vmem>>, %arg2: memref<16x32xf32, #tpu.memory_space<vmem>>, %arg3: memref<33x32xf32, #tpu.memory_space<vmem>>, %arg4: memref<16x1xf32, #tpu.memory_space<vmem>>, %arg5: memref<33x1xf32, #tpu.memory_space<vmem>>, %arg6: memref<1x1xf32, #tpu.memory_space<vmem>>, %arg7: memref<2x32x256xf32, #tpu.memory_space<vmem>>) attributes {dimension_semantics = [#tpu.dimension_semantics<parallel>], iteration_bounds = array<i64: 1>, scalar_prefetch = 0 : i64, scratch_operands = 0 : i64, tpu.core_type = #tpu.core_type<tc>, window_params = [{transform_indices = @transform_0, window_bounds = array<i64: 2, 32, 256>}, {pipeline_mode = #tpu.pipeline_mode<synchronous>, transform_indices = @transform_1, window_bounds = array<i64: 16, 32>}, {pipeline_mode = #tpu.pipeline_mode<synchronous>, transform_indices = @transform_2, window_bounds = array<i64: 33, 32>}, {pipeline_mode = #tpu.pipeline_mode<synchronous>, transform_indices = @transform_3, window_bounds = array<i64: 16, 1>}, {pipeline_mode = #tpu.pipeline_mode<synchronous>, transform_indices = @transform_4, window_bounds = array<i64: 33, 1>}, {pipeline_mode = #tpu.pipeline_mode<synchronous>, transform_indices = @transform_5, window_bounds = array<i64: 1, 1>}, {transform_indices = @transform_6, window_bounds = array<i64: 2, 32, 256>}]} {
    %c0 = arith.constant 0 : index
    %c0_0 = arith.constant 0 : index
    %c0_1 = arith.constant 0 : index
    %0 = vector.load %arg1[%c0, %c0_0, %c0_1] : memref<2x32x256xf32, #tpu.memory_space<vmem>>, vector<1x32x256xf32>
    %1 = vector.shape_cast %0 : vector<1x32x256xf32> to vector<32x256xf32>
    %c0_2 = arith.constant 0 : index
    %c0_3 = arith.constant 0 : index
    %2 = vector.load %arg2[%c0_2, %c0_3] : memref<16x32xf32, #tpu.memory_space<vmem>>, vector<16x32xf32>
    %cst = arith.constant dense<0.000000e+00> : vector<16x256xf32>
    %3 = tpu.matmul %2, %1, %cst {dimension_numbers = #tpu.dot_dimension_numbers<[1], [0], [0], [1], [0, 0, 1, 1], [], []>} : vector<16x32xf32>, vector<32x256xf32>, vector<16x256xf32> -> vector<16x256xf32>
    %c0_4 = arith.constant 0 : index
    %c0_5 = arith.constant 0 : index
    %4 = vector.load %arg4[%c0_4, %c0_5] : memref<16x1xf32, #tpu.memory_space<vmem>>, vector<16x1xf32>
    %5 = vector.broadcast %4 : vector<16x1xf32> to vector<16x256xf32>
    %6 = arith.addf %3, %5 : vector<16x256xf32>
    %7 = vector.extract_strided_slice %6 {offsets = [0, 0], sizes = [8, 256], strides = [1, 1]} : vector<16x256xf32> to vector<8x256xf32>
    %8 = vector.extract_strided_slice %6 {offsets = [8, 0], sizes = [8, 256], strides = [1, 1]} : vector<16x256xf32> to vector<8x256xf32>
    %c0_6 = arith.constant 0 : index
    %c0_7 = arith.constant 0 : index
    %9 = vector.load %arg3[%c0_6, %c0_7] : memref<33x32xf32, #tpu.memory_space<vmem>>, vector<33x32xf32>
    %cst_8 = arith.constant dense<0.000000e+00> : vector<33x256xf32>
    %10 = tpu.matmul %9, %1, %cst_8 {dimension_numbers = #tpu.dot_dimension_numbers<[1], [0], [0], [1], [0, 0, 1, 1], [], []>} : vector<33x32xf32>, vector<32x256xf32>, vector<33x256xf32> -> vector<33x256xf32>
    %c0_9 = arith.constant 0 : index
    %c0_10 = arith.constant 0 : index
    %11 = vector.load %arg5[%c0_9, %c0_10] : memref<33x1xf32, #tpu.memory_space<vmem>>, vector<33x1xf32>
    %12 = vector.broadcast %11 : vector<33x1xf32> to vector<33x256xf32>
    %13 = arith.addf %10, %12 : vector<33x256xf32>
    %14 = tpu.transpose %7, [1, 0] : vector<8x256xf32> -> vector<256x8xf32>
    %15 = arith.truncf %14 : vector<256x8xf32> to vector<256x8xbf16>
    %16 = arith.truncf %8 : vector<8x256xf32> to vector<8x256xbf16>
    %cst_11 = arith.constant dense<0.000000e+00> : vector<256x256xf32>
    %17 = tpu.matmul %15, %16, %cst_11 {dimension_numbers = #tpu.dot_dimension_numbers<[1], [0], [0], [1], [0, 0, 1, 1], [], []>} : vector<256x8xbf16>, vector<8x256xbf16>, vector<256x256xf32> -> vector<256x256xf32>
    %cst_12 = arith.constant dense<0xFF800000> : vector<256xf32>
    %18 = vector.multi_reduction <maximumf>, %17, %cst_12 [1] : vector<256x256xf32> to vector<256xf32>
    %19 = vector.shape_cast %18 : vector<256xf32> to vector<256x1xf32>
    %20 = vector.broadcast %19 : vector<256x1xf32> to vector<256x256xf32>
    %21 = arith.subf %17, %20 : vector<256x256xf32>
    %22 = math.exp %21 : vector<256x256xf32>
    %23 = arith.truncf %13 : vector<33x256xf32> to vector<33x256xbf16>
    %24 = arith.truncf %22 : vector<256x256xf32> to vector<256x256xbf16>
    %cst_13 = arith.constant dense<0.000000e+00> : vector<33x256xf32>
    %25 = tpu.matmul %23, %24, %cst_13 {dimension_numbers = #tpu.dot_dimension_numbers<[1], [1], [0], [0], [0, 0, 1, 0], [], []>} : vector<33x256xbf16>, vector<256x256xbf16>, vector<33x256xf32> -> vector<33x256xf32>
    %26 = vector.extract_strided_slice %25 {offsets = [0, 0], sizes = [32, 256], strides = [1, 1]} : vector<33x256xf32> to vector<32x256xf32>
    %27 = vector.extract_strided_slice %25 {offsets = [32, 0], sizes = [1, 256], strides = [1, 1]} : vector<33x256xf32> to vector<1x256xf32>
    %c0_14 = arith.constant 0 : index
    %c0_15 = arith.constant 0 : index
    %28 = vector.load %arg6[%c0_14, %c0_15] : memref<1x1xf32, #tpu.memory_space<vmem>>, vector<1x1xf32>
    %29 = tpu.reciprocal %27 {approx = true} : vector<1x256xf32> -> vector<1x256xf32>
    %30 = vector.broadcast %28 : vector<1x1xf32> to vector<1x256xf32>
    %31 = arith.mulf %30, %29 : vector<1x256xf32>
    %32 = vector.broadcast %31 : vector<1x256xf32> to vector<32x256xf32>
    %33 = arith.mulf %26, %32 : vector<32x256xf32>
    %34 = arith.addf %33, %1 : vector<32x256xf32>
    %c0_16 = arith.constant 0 : index
    %c0_17 = arith.constant 0 : index
    %c0_18 = arith.constant 0 : index
    %35 = vector.load %arg7[%c0_16, %c0_17, %c0_18] : memref<2x32x256xf32, #tpu.memory_space<vmem>>, vector<1x32x256xf32>
    %36 = vector.shape_cast %35 : vector<1x32x256xf32> to vector<32x256xf32>
    %37 = vector.shape_cast %34 : vector<32x256xf32> to vector<1x32x256xf32>
    tpu.vector_store %arg7[%c0_16, %c0_17, %c0_18], %37 {strides = array<i32>} : memref<2x32x256xf32, #tpu.memory_space<vmem>>, vector<1x32x256xf32>,
    %c1 = arith.constant 1 : index
    %c0_19 = arith.constant 0 : index
    %c0_20 = arith.constant 0 : index
    %38 = vector.load %arg1[%c1, %c0_19, %c0_20] : memref<2x32x256xf32, #tpu.memory_space<vmem>>, vector<1x32x256xf32>
    %39 = vector.shape_cast %38 : vector<1x32x256xf32> to vector<32x256xf32>
    %c0_21 = arith.constant 0 : index
    %c0_22 = arith.constant 0 : index
    %40 = vector.load %arg2[%c0_21, %c0_22] : memref<16x32xf32, #tpu.memory_space<vmem>>, vector<16x32xf32>
    %cst_23 = arith.constant dense<0.000000e+00> : vector<16x256xf32>
    %41 = tpu.matmul %40, %39, %cst_23 {dimension_numbers = #tpu.dot_dimension_numbers<[1], [0], [0], [1], [0, 0, 1, 1], [], []>} : vector<16x32xf32>, vector<32x256xf32>, vector<16x256xf32> -> vector<16x256xf32>
    %c0_24 = arith.constant 0 : index
    %c0_25 = arith.constant 0 : index
    %42 = vector.load %arg4[%c0_24, %c0_25] : memref<16x1xf32, #tpu.memory_space<vmem>>, vector<16x1xf32>
    %43 = vector.broadcast %42 : vector<16x1xf32> to vector<16x256xf32>
    %44 = arith.addf %41, %43 : vector<16x256xf32>
    %45 = vector.extract_strided_slice %44 {offsets = [0, 0], sizes = [8, 256], strides = [1, 1]} : vector<16x256xf32> to vector<8x256xf32>
    %46 = vector.extract_strided_slice %44 {offsets = [8, 0], sizes = [8, 256], strides = [1, 1]} : vector<16x256xf32> to vector<8x256xf32>
    %c0_26 = arith.constant 0 : index
    %c0_27 = arith.constant 0 : index
    %47 = vector.load %arg3[%c0_26, %c0_27] : memref<33x32xf32, #tpu.memory_space<vmem>>, vector<33x32xf32>
    %cst_28 = arith.constant dense<0.000000e+00> : vector<33x256xf32>
    %48 = tpu.matmul %47, %39, %cst_28 {dimension_numbers = #tpu.dot_dimension_numbers<[1], [0], [0], [1], [0, 0, 1, 1], [], []>} : vector<33x32xf32>, vector<32x256xf32>, vector<33x256xf32> -> vector<33x256xf32>
    %c0_29 = arith.constant 0 : index
    %c0_30 = arith.constant 0 : index
    %49 = vector.load %arg5[%c0_29, %c0_30] : memref<33x1xf32, #tpu.memory_space<vmem>>, vector<33x1xf32>
    %50 = vector.broadcast %49 : vector<33x1xf32> to vector<33x256xf32>
    %51 = arith.addf %48, %50 : vector<33x256xf32>
    %52 = tpu.transpose %45, [1, 0] : vector<8x256xf32> -> vector<256x8xf32>
    %53 = arith.truncf %52 : vector<256x8xf32> to vector<256x8xbf16>
    %54 = arith.truncf %46 : vector<8x256xf32> to vector<8x256xbf16>
    %cst_31 = arith.constant dense<0.000000e+00> : vector<256x256xf32>
    %55 = tpu.matmul %53, %54, %cst_31 {dimension_numbers = #tpu.dot_dimension_numbers<[1], [0], [0], [1], [0, 0, 1, 1], [], []>} : vector<256x8xbf16>, vector<8x256xbf16>, vector<256x256xf32> -> vector<256x256xf32>
    %cst_32 = arith.constant dense<0xFF800000> : vector<256xf32>
    %56 = vector.multi_reduction <maximumf>, %55, %cst_32 [1] : vector<256x256xf32> to vector<256xf32>
    %57 = vector.shape_cast %56 : vector<256xf32> to vector<256x1xf32>
    %58 = vector.broadcast %57 : vector<256x1xf32> to vector<256x256xf32>
    %59 = arith.subf %55, %58 : vector<256x256xf32>
    %60 = math.exp %59 : vector<256x256xf32>
    %61 = arith.truncf %51 : vector<33x256xf32> to vector<33x256xbf16>
    %62 = arith.truncf %60 : vector<256x256xf32> to vector<256x256xbf16>
    %cst_33 = arith.constant dense<0.000000e+00> : vector<33x256xf32>
    %63 = tpu.matmul %61, %62, %cst_33 {dimension_numbers = #tpu.dot_dimension_numbers<[1], [1], [0], [0], [0, 0, 1, 0], [], []>} : vector<33x256xbf16>, vector<256x256xbf16>, vector<33x256xf32> -> vector<33x256xf32>
    %64 = vector.extract_strided_slice %63 {offsets = [0, 0], sizes = [32, 256], strides = [1, 1]} : vector<33x256xf32> to vector<32x256xf32>
    %65 = vector.extract_strided_slice %63 {offsets = [32, 0], sizes = [1, 256], strides = [1, 1]} : vector<33x256xf32> to vector<1x256xf32>
    %c0_34 = arith.constant 0 : index
    %c0_35 = arith.constant 0 : index
    %66 = vector.load %arg6[%c0_34, %c0_35] : memref<1x1xf32, #tpu.memory_space<vmem>>, vector<1x1xf32>
    %67 = tpu.reciprocal %65 {approx = true} : vector<1x256xf32> -> vector<1x256xf32>
    %68 = vector.broadcast %66 : vector<1x1xf32> to vector<1x256xf32>
    %69 = arith.mulf %68, %67 : vector<1x256xf32>
    %70 = vector.broadcast %69 : vector<1x256xf32> to vector<32x256xf32>
    %71 = arith.mulf %64, %70 : vector<32x256xf32>
    %72 = arith.addf %71, %39 : vector<32x256xf32>
    %c1_36 = arith.constant 1 : index
    %c0_37 = arith.constant 0 : index
    %c0_38 = arith.constant 0 : index
    %73 = vector.load %arg7[%c1_36, %c0_37, %c0_38] : memref<2x32x256xf32, #tpu.memory_space<vmem>>, vector<1x32x256xf32>
    %74 = vector.shape_cast %73 : vector<1x32x256xf32> to vector<32x256xf32>
    %75 = vector.shape_cast %72 : vector<32x256xf32> to vector<1x32x256xf32>
    tpu.vector_store %arg7[%c1_36, %c0_37, %c0_38], %75 {strides = array<i32>} : memref<2x32x256xf32, #tpu.memory_space<vmem>>, vector<1x32x256xf32>,
    return
  }
  func.func @transform_0(%arg0: i32) -> (i32, i32, i32) {
    %c0_i32 = arith.constant 0 : i32
    %c0_i32_0 = arith.constant 0 : i32
    %c0_i32_1 = arith.constant 0 : i32
    return %arg0, %c0_i32, %c0_i32_0 : i32, i32, i32
  }
  func.func @transform_1(%arg0: i32) -> (i32, i32) {
    %c0_i32 = arith.constant 0 : i32
    %c0_i32_0 = arith.constant 0 : i32
    %c0_i32_1 = arith.constant 0 : i32
    return %c0_i32, %c0_i32_0 : i32, i32
  }
  func.func @transform_2(%arg0: i32) -> (i32, i32) {
    %c0_i32 = arith.constant 0 : i32
    %c0_i32_0 = arith.constant 0 : i32
    %c0_i32_1 = arith.constant 0 : i32
    return %c0_i32, %c0_i32_0 : i32, i32
  }
  func.func @transform_3(%arg0: i32) -> (i32, i32) {
    %c0_i32 = arith.constant 0 : i32
    %c0_i32_0 = arith.constant 0 : i32
    %c0_i32_1 = arith.constant 0 : i32
    return %c0_i32, %c0_i32_0 : i32, i32
  }
  func.func @transform_4(%arg0: i32) -> (i32, i32) {
    %c0_i32 = arith.constant 0 : i32
    %c0_i32_0 = arith.constant 0 : i32
    %c0_i32_1 = arith.constant 0 : i32
    return %c0_i32, %c0_i32_0 : i32, i32
  }
  func.func @transform_5(%arg0: i32) -> (i32, i32) {
    %c0_i32 = arith.constant 0 : i32
    %c0_i32_0 = arith.constant 0 : i32
    %c0_i32_1 = arith.constant 0 : i32
    return %c0_i32, %c0_i32_0 : i32, i32
  }
  func.func @transform_6(%arg0: i32) -> (i32, i32, i32) {
    %c0_i32 = arith.constant 0 : i32
    %c0_i32_0 = arith.constant 0 : i32
    %c0_i32_1 = arith.constant 0 : i32
    return %arg0, %c0_i32, %c0_i32_0 : i32, i32, i32
  }
}

</mosaic_0001>

<bundles_post_ra>
// kernel: self_attn_forward.1
= control target key start
LH: loop header
LB: loop body
LE: loop exit
PB: predicated region body
PF: predicated region fallthrough
CT: control target
= control target key end

     0   :  { %v2343_v3 = vmov 0   ;;  %vm48_vm0 = vcmask 261120   ;;  %vm346_vm1 = vcmask 1043456   ;;  %vm297_vm2 = vcmask 64512   ;;  %s3463_s0 = inlined_call_operand.vmem [shape: f32[2,32,256], index: 0, kind: input, shape index: {}, may-alias: {0,6}]   ;;  %s3464_s3 = inlined_call_operand.vmem [shape: f32[16,1], index: 3, kind: input, shape index: {}]   ;;  %s3465_s1 = inlined_call_operand.vmem [shape: f32[16,32], index: 1, kind: input, shape index: {}]   ;;  %s3466_s2 = inlined_call_operand.vmem [shape: f32[33,32], index: 2, kind: input, shape index: {}]   ;;  %s3467_s4 = inlined_call_operand.vmem [shape: f32[33,1], index: 4, kind: input, shape index: {}]   ;;  %s3468_s5 = inlined_call_operand.<no memory space> [shape: f32[1,1], index: 5, kind: input, shape index: {}]   ;;  %s3469_s6 = inlined_call_operand.vmem [shape: f32[2,32,256], index: 6, kind: output, shape index: {}, may-alias: {0,6}]  }
   0x1   :  { %v32_v0 = vld [vmem:[%s3463_s0 + $0x30] sm:$0xff]  ;;  %v33_v1 = vld [vmem:[%s3463_s0 + $0x38] sm:$0xff]  ;;  %v30_v2 = vld [vmem:[%s3463_s0 + $0x20] sm:$0xff]  ;;  %2059 = vset.pattern.permute.xlu0 %v2343_v3  ;;  %2060 = vset.pattern.permute.xlu2 %v2343_v3 }
   0x2   :  { %67 = vmatpush.msra.mxu2 %v32_v0  ;;  %90 = vmatpush.msra.mxu3 %v33_v1  ;;  %v31_v4 = vld [vmem:[%s3463_s0 + $0x28] sm:$0xff]  ;;  %v28_v5 = vld [vmem:[%s3463_s0 + $0x10] sm:$0xff]  ;;  %v29_v6 = vld [vmem:[%s3463_s0 + $0x18] sm:$0xff] }
   0x3   :  { %v2402_v7 = vld [vmem:[%s3464_s3] sm:$0xff]  ;;  %v27_v9 = vld [vmem:[%s3463_s0 + $0x8] sm:$0xff] }
   0x4   :  { %68 = vmatpush.msra.mxu2 %v30_v2  ;;  %91 = vmatpush.msra.mxu3 %v31_v4  ;;  %v26_v8 = vld [vmem:[%s3463_s0] sm:$0xff]  ;;  %v2419_v11 = vld [vmem:[%s3464_s3 + $0x8] sm:$0xff] }
   0x5   :  { %40 = vperm.xlu0 %2059, %v2402_v7   ;;  %v34_v10 = vld [vmem:[%s3465_s1] sm:$0xff]  ;;  %v35_v12 = vld [vmem:[%s3465_s1 + $0x8] sm:$0xff] }
   0x6   :  { %69 = vmatpush.msra.mxu2 %v28_v5  ;;  %92 = vmatpush.msra.mxu3 %v29_v6 }
   0x8   :  { %70 = vmatpush.msra.mxu2 %v26_v8  ;;  %93 = vmatpush.msra.mxu3 %v27_v9 }
   0x9   :  { %1949 = vmatmul.msk.f32.vlgmr.msra.gmra.mxu2 %vm48_vm0, %v34_v10  ;;  %1951 = vmatmul.msk.f32.vlgmr.msra.gmra.mxu3 %vm48_vm0, %v34_v10 }
   0xa   :  { %163 = vmatpush.msrb.mxu2 %v32_v0  ;;  %195 = vmatpush.msrb.mxu3 %v33_v1 }
   0xc   :  { %164 = vmatpush.msrb.mxu2 %v30_v2  ;;  %196 = vmatpush.msrb.mxu3 %v31_v4 }
   0xd   :  { %45 = vperm.xlu0 %2059, %v2419_v11  }
   0xe   :  { %165 = vmatpush.msrb.mxu2 %v28_v5  ;;  %197 = vmatpush.msrb.mxu3 %v29_v6 }
  0x10   :  { %166 = vmatpush.msrb.mxu2 %v26_v8  ;;  %198 = vmatpush.msrb.mxu3 %v27_v9 }
  0x11   :  { %1950 = vmatmul.msk.f32.gmra.mxu2 %vm48_vm0, %v35_v12  ;;  %1952 = vmatmul.msk.f32.gmra.mxu3 %vm48_vm0, %v35_v12 }
  0x77   :  { %v41_v13 = vpop.permute.xlu0 %40 }
  0x7f   :  { %v46_v18 = vpop.permute.xlu0 %45 }
  0x8c   :  { %v72_v14 = vpop.f32.mrf.mxu2  ;;  %v95_v15 = vpop.f32.mrf.mxu3 }
  0x8d   :  { %v96_v16 = vadd.f32 %v95_v15, %v41_v13  ;;  %v73_v17 = vadd.f32 %v72_v14, %v41_v13 }
  0x8f   :  { %215 = vxpose.xlu1.b32.start.end [1/1] (short) %v73_v17, 128 }
  0x94   :  { %v75_v19 = vpop.f32.mrf.mxu2  ;;  %v98_v20 = vpop.f32.mrf.mxu3 }
  0x95   :  { %v76_v21 = vadd.f32 %v75_v19, %v46_v18  ;;  %v99_v22 = vadd.f32 %v98_v20, %v46_v18 }
  0x97   :  { %v295_v23 = vpack.c.bf16 %v76_v21, %v76_v21  ;;  %v296_v24 = vpack.c.bf16 %v99_v22, %v99_v22 }
  0x99   :  { %v348_v25 = vsel %vm346_vm1, %v295_v23, 0  ;;  %v351_v26 = vsel %vm346_vm1, %v296_v24, 0 }
  0x9a   :  { %360 = vmatpush.bf16.msra.mxu0 %v348_v25  ;;  %449 = vmatpush.bf16.msra.mxu1 %v351_v26 }
 0x10f   :  { %247 = vxpose.xlu1.b32.start.end [1/1] (short) %v96_v16, 128 }
 0x133   :  { %v231_v27 = vpop.trf.xlu1 }
 0x13b   :  { %v232_v28 = vpop.trf.xlu1 }
 0x13c   :  { %v279_v29 = vpack.c.bf16 %v232_v28, %v231_v27 }
 0x13e   :  { %1963 = vmatmul.msk.bf16.vlgmr.msra.gmra.mxu0 %vm297_vm2, %v279_v29  ;;  %1979 = vmatmul.msk.bf16.vlgmr.msra.gmra.mxu1 %vm297_vm2, %v279_v29 }
 0x143   :  { %v233_v30 = vpop.trf.xlu1 }
 0x14b   :  { %v234_v31 = vpop.trf.xlu1 }
 0x14c   :  { %v280_v32 = vpack.c.bf16 %v234_v31, %v233_v30 }
 0x14e   :  { %1964 = vmatmul.msk.bf16.gmra.mxu0 %vm297_vm2, %v280_v32  ;;  %1980 = vmatmul.msk.bf16.gmra.mxu1 %vm297_vm2, %v280_v32 }
 0x153   :  { %v235_v33 = vpop.trf.xlu1 }
 0x15b   :  { %v236_v34 = vpop.trf.xlu1 }
 0x15c   :  { %v281_v35 = vpack.c.bf16 %v236_v34, %v235_v33 }
 0x15e   :  { %1965 = vmatmul.msk.bf16.gmra.mxu0 %vm297_vm2, %v281_v35  ;;  %1981 = vmatmul.msk.bf16.gmra.mxu1 %vm297_vm2, %v281_v35 }
 0x162   :  { %2061 = vset.pattern.permute.xlu1 %v2343_v3 }
 0x163   :  { %v237_v36 = vpop.trf.xlu1 }
 0x16b   :  { %v238_v37 = vpop.trf.xlu1 }
 0x16c   :  { %v282_v38 = vpack.c.bf16 %v238_v37, %v237_v36 }
 0x16e   :  { %1966 = vmatmul.msk.bf16.gmra.mxu0 %vm297_vm2, %v282_v38  ;;  %1982 = vmatmul.msk.bf16.gmra.mxu1 %vm297_vm2, %v282_v38 }
 0x173   :  { %v239_v39 = vpop.trf.xlu1 }
 0x17b   :  { %v240_v40 = vpop.trf.xlu1 }
 0x17c   :  { %v283_v41 = vpack.c.bf16 %v240_v40, %v239_v39 }
 0x17e   :  { %1967 = vmatmul.msk.bf16.gmra.mxu0 %vm297_vm2, %v283_v41  ;;  %1983 = vmatmul.msk.bf16.gmra.mxu1 %vm297_vm2, %v283_v41 }
 0x183   :  { %v241_v42 = vpop.trf.xlu1 }
 0x18b   :  { %v242_v43 = vpop.trf.xlu1 }
 0x18c   :  { %v284_v44 = vpack.c.bf16 %v242_v43, %v241_v42 }
 0x18e   :  { %1968 = vmatmul.msk.bf16.gmra.mxu0 %vm297_vm2, %v284_v44  ;;  %1984 = vmatmul.msk.bf16.gmra.mxu1 %vm297_vm2, %v284_v44 }
 0x193   :  { %v243_v45 = vpop.trf.xlu1 }
 0x19b   :  { %v244_v46 = vpop.trf.xlu1 }
 0x19c   :  { %v285_v47 = vpack.c.bf16 %v244_v46, %v243_v45 }
 0x19e   :  { %1969 = vmatmul.msk.bf16.gmra.mxu0 %vm297_vm2, %v285_v47  ;;  %1985 = vmatmul.msk.bf16.gmra.mxu1 %vm297_vm2, %v285_v47 }
 0x1a3   :  { %v245_v48 = vpop.trf.xlu1 }
 0x1ab   :  { %v246_v49 = vpop.trf.xlu1 }
 0x1ac   :  { %v286_v50 = vpack.c.bf16 %v246_v49, %v245_v48 }
 0x1ae   :  { %1970 = vmatmul.msk.bf16.gmra.mxu0 %vm297_vm2, %v286_v50  ;;  %1986 = vmatmul.msk.bf16.gmra.mxu1 %vm297_vm2, %v286_v50 }
 0x1b3   :  { %v263_v51 = vpop.trf.xlu1 }
 0x1bb   :  { %v2446_v52 = vpop.f32.mrf.mxu0  ;;  %v2448_v53 = vpop.f32.mrf.mxu1 }
 0x1bc   :  { %3510 = vst [vmem:[#allocation3_spill] sm:$0xff] %v2446_v52  ;;  %v264_v54 = vpop.trf.xlu1 }
 0x1bd   :  { %3511 = vst [vmem:[#allocation4_spill] sm:$0xff] %v2448_v53  ;;  %v287_v55 = vpack.c.bf16 %v264_v54, %v263_v51 }
 0x1bf   :  { %1971 = vmatmul.msk.bf16.gmra.mxu0 %vm297_vm2, %v287_v55  ;;  %1987 = vmatmul.msk.bf16.gmra.mxu1 %vm297_vm2, %v287_v55 }
 0x1c3   :  { %v2452_v56 = vpop.f32.mrf.mxu0  ;;  %v2454_v57 = vpop.f32.mrf.mxu1 }
 0x1c4   :  { %3512 = vst [vmem:[#allocation5_spill] sm:$0xff] %v2454_v57  ;;  %v265_v58 = vpop.trf.xlu1 }
 0x1cb   :  { %v2456_v59 = vpop.f32.mrf.mxu0  ;;  %v2458_v60 = vpop.f32.mrf.mxu1 }
 0x1cc   :  { %v266_v61 = vpop.trf.xlu1 }
 0x1cd   :  { %v288_v62 = vpack.c.bf16 %v266_v61, %v265_v58 }
 0x1cf   :  { %1972 = vmatmul.msk.bf16.gmra.mxu0 %vm297_vm2, %v288_v62  ;;  %1988 = vmatmul.msk.bf16.gmra.mxu1 %vm297_vm2, %v288_v62 }
 0x1d3   :  { %v2462_v63 = vpop.f32.mrf.mxu0  ;;  %v2464_v0 = vpop.f32.mrf.mxu1 }
 0x1d4   :  { %3513 = vst [vmem:[#allocation6_spill] sm:$0xff] %v2462_v63  ;;  %v267_v1 = vpop.trf.xlu1 }
 0x1d5   :  { %3514 = vst [vmem:[#allocation7_spill] sm:$0xff] %v2464_v0 }
 0x1db   :  { %v2466_v2 = vpop.f32.mrf.mxu0  ;;  %v2468_v3 = vpop.f32.mrf.mxu1 }
 0x1dc   :  { %3515 = vst [vmem:[#allocation8_spill] sm:$0xff] %v2466_v2  ;;  %v268_v4 = vpop.trf.xlu1 }
 0x1dd   :  { %3516 = vst [vmem:[#allocation9_spill] sm:$0xff] %v2468_v3  ;;  %v289_v5 = vpack.c.bf16 %v268_v4, %v267_v1 }
 0x1df   :  { %1973 = vmatmul.msk.bf16.gmra.mxu0 %vm297_vm2, %v289_v5  ;;  %1989 = vmatmul.msk.bf16.gmra.mxu1 %vm297_vm2, %v289_v5 }
 0x1e3   :  { %v2472_v6 = vpop.f32.mrf.mxu0  ;;  %v2474_v8 = vpop.f32.mrf.mxu1 }
 0x1e4   :  { %3517 = vst [vmem:[#allocation10_spill] sm:$0xff] %v2474_v8  ;;  %v269_v9 = vpop.trf.xlu1 }
 0x1eb   :  { %v2476_v10 = vpop.f32.mrf.mxu0  ;;  %v2478_v12 = vpop.f32.mrf.mxu1 }
 0x1ec   :  { %3518 = vst [vmem:[#allocation11_spill] sm:$0xff] %v2476_v10  ;;  %v270_v13 = vpop.trf.xlu1 }
 0x1ed   :  { %3519 = vst [vmem:[#allocation12_spill] sm:$0xff] %v2478_v12  ;;  %v290_v14 = vpack.c.bf16 %v270_v13, %v269_v9  ;;  %v549_v13 = vmax.f32 %v2476_v10, %v2478_v12 }
 0x1ef   :  { %1974 = vmatmul.msk.bf16.gmra.mxu0 %vm297_vm2, %v290_v14  ;;  %1990 = vmatmul.msk.bf16.gmra.mxu1 %vm297_vm2, %v290_v14 }
 0x1f3   :  { %v2482_v15 = vpop.f32.mrf.mxu0  ;;  %v2484_v16 = vpop.f32.mrf.mxu1 }
 0x1f4   :  { %v271_v17 = vpop.trf.xlu1 }
 0x1fb   :  { %v2486_v18 = vpop.f32.mrf.mxu0  ;;  %v2488_v19 = vpop.f32.mrf.mxu1 }
 0x1fc   :  { %3520 = vst [vmem:[#allocation13_spill] sm:$0xff] %v2486_v18  ;;  %v272_v20 = vpop.trf.xlu1  ;;  %v555_v61 = vmax.f32 %v2486_v18, %v2488_v19 }
 0x1fd   :  { %3521 = vst [vmem:[#allocation14_spill] sm:$0xff] %v2488_v19  ;;  %v291_v21 = vpack.c.bf16 %v272_v20, %v271_v17  ;;  %v543_v20 = vmax.f32 %v2466_v2, %v2468_v3 }
 0x1ff   :  { %1975 = vmatmul.msk.bf16.gmra.mxu0 %vm297_vm2, %v291_v21  ;;  %1991 = vmatmul.msk.bf16.gmra.mxu1 %vm297_vm2, %v291_v21 }
 0x203   :  { %v2492_v22 = vpop.f32.mrf.mxu0  ;;  %v2494_v23 = vpop.f32.mrf.mxu1 }
 0x204   :  { %3522 = vst [vmem:[#allocation15_spill] sm:$0xff] %v2492_v22  ;;  %v273_v24 = vpop.trf.xlu1  ;;  %v558_v4 = vmax.f32 %v2492_v22, %v2494_v23 }
 0x205   :  { %3523 = vst [vmem:[#allocation16_spill] sm:$0xff] %v2494_v23 }
 0x20b   :  { %v2496_v25 = vpop.f32.mrf.mxu0  ;;  %v2498_v26 = vpop.f32.mrf.mxu1 }
 0x20c   :  { %3524 = vst [vmem:[#allocation17_spill] sm:$0xff] %v2496_v25  ;;  %v274_v27 = vpop.trf.xlu1  ;;  %v561_v49 = vmax.f32 %v2496_v25, %v2498_v26 }
 0x20d   :  { %3525 = vst [vmem:[#allocation18_spill] sm:$0xff] %v2498_v26  ;;  %v292_v28 = vpack.c.bf16 %v274_v27, %v273_v24  ;;  %v540_v27 = vmax.f32 %v2462_v63, %v2464_v0  ;;  %v2646_v63 = vld [vmem:[%s3466_s2 + $0x18] sm:$0xff] }
 0x20f   :  { %1976 = vmatmul.msk.bf16.gmra.mxu0 %vm297_vm2, %v292_v28  ;;  %1992 = vmatmul.msk.bf16.gmra.mxu1 %vm297_vm2, %v292_v28 }
 0x213   :  { %v2502_v29 = vpop.f32.mrf.mxu0  ;;  %v2504_v30 = vpop.f32.mrf.mxu1 }
 0x214   :  { %3526 = vst [vmem:[#allocation19_spill] sm:$0xff] %v2502_v29  ;;  %v275_v31 = vpop.trf.xlu1  ;;  %v564_v54 = vmax.f32 %v2502_v29, %v2504_v30 }
 0x215   :  { %3527 = vst [vmem:[#allocation20_spill] sm:$0xff] %v2504_v30 }
 0x21b   :  { %v2506_v32 = vpop.f32.mrf.mxu0  ;;  %v2508_v33 = vpop.f32.mrf.mxu1 }
 0x21c   :  { %3528 = vst [vmem:[#allocation21_spill] sm:$0xff] %v2508_v33  ;;  %v276_v34 = vpop.trf.xlu1 }
 0x21d   :  { %v293_v35 = vpack.c.bf16 %v276_v34, %v275_v31  ;;  %v531_v34 = vmax.f32 %v2446_v52, %v2448_v53 }
 0x21f   :  { %1977 = vmatmul.msk.bf16.gmra.mxu0 %vm297_vm2, %v293_v35  ;;  %1993 = vmatmul.msk.bf16.gmra.mxu1 %vm297_vm2, %v293_v35 }
 0x223   :  { %v2512_v36 = vpop.f32.mrf.mxu0  ;;  %v2514_v37 = vpop.f32.mrf.mxu1 }
 0x224   :  { %3529 = vst [vmem:[#allocation22_spill] sm:$0xff] %v2512_v36  ;;  %v277_v38 = vpop.trf.xlu1  ;;  %v570_v46 = vmax.f32 %v2512_v36, %v2514_v37 }
 0x225   :  { %3530 = vst [vmem:[#allocation23_spill] sm:$0xff] %v2514_v37 }
 0x22b   :  { %v2516_v39 = vpop.f32.mrf.mxu0  ;;  %v2518_v40 = vpop.f32.mrf.mxu1 }
 0x22c   :  { %v278_v41 = vpop.trf.xlu1  ;;  %v573_v42 = vmax.f32 %v2516_v39, %v2518_v40 }
 0x22d   :  { %v294_v43 = vpack.c.bf16 %v278_v41, %v277_v38 }
 0x22e   :  { %574 = vmax.xlane.f32.xlu1 %v573_v42 }
 0x22f   :  { %1978 = vmatmul.msk.bf16.gmra.mxu0 %vm297_vm2, %v294_v43  ;;  %1994 = vmatmul.msk.bf16.gmra.mxu1 %vm297_vm2, %v294_v43 }
 0x233   :  { %v2524_v44 = vpop.f32.mrf.mxu0  ;;  %v2526_v45 = vpop.f32.mrf.mxu1 }
 0x236   :  { %571 = vmax.xlane.f32.xlu1 %v570_v46 }
 0x23c   :  { %v2530_v47 = vpop.f32.mrf.mxu0  ;;  %v2532_v48 = vpop.f32.mrf.mxu1 }
 0x23e   :  { %562 = vmax.xlane.f32.xlu1 %v561_v49 }
 0x244   :  { %v2536_v50 = vpop.f32.mrf.mxu0  ;;  %v2538_v51 = vpop.f32.mrf.mxu1 }
 0x246   :  { %565 = vmax.xlane.f32.xlu1 %v564_v54 }
 0x24c   :  { %v2542_v55 = vpop.f32.mrf.mxu0  ;;  %v2544_v58 = vpop.f32.mrf.mxu1 }
 0x24d   :  { %v585_v22 = vmax.f32 %v2542_v55, %v2544_v58 }
 0x24e   :  { %556 = vmax.xlane.f32.xlu1 %v555_v61 }
 0x254   :  { %v2548_v62 = vpop.f32.mrf.mxu0  ;;  %v2550_v1 = vpop.f32.mrf.mxu1 }
 0x255   :  { %v588_v18 = vmax.f32 %v2548_v62, %v2550_v1 }
 0x256   :  { %559 = vmax.xlane.f32.xlu1 %v558_v4  ;;  %v2599_v4 = vld [vmem:[%s3466_s2] sm:$0xff] }
 0x257   :  { %1953 = vmatmul.msk.f32.vlgmr.msrb.gmra.mxu2 %vm48_vm0, %v2599_v4  ;;  %1958 = vmatmul.msk.f32.vlgmr.msrb.gmra.mxu3 %vm48_vm0, %v2599_v4 }
 0x25c   :  { %v2554_v5 = vpop.f32.mrf.mxu0  ;;  %v2556_v9 = vpop.f32.mrf.mxu1 }
 0x25e   :  { %550 = vmax.xlane.f32.xlu1 %v549_v13 }
 0x264   :  { %v2560_v14 = vpop.f32.mrf.mxu0  ;;  %v2562_v17 = vpop.f32.mrf.mxu1 }
 0x265   :  { %v594_v12 = vmax.f32 %v2560_v14, %v2562_v17 }
 0x266   :  { %544 = vmax.xlane.f32.xlu1 %v543_v20 }
 0x26c   :  { %v2566_v21 = vpop.f32.mrf.mxu0  ;;  %v2568_v24 = vpop.f32.mrf.mxu1 }
 0x26e   :  { %541 = vmax.xlane.f32.xlu1 %v540_v27 }
 0x274   :  { %v2572_v28 = vpop.f32.mrf.mxu0  ;;  %v2574_v31 = vpop.f32.mrf.mxu1 }
 0x275   :  { %v600_v0 = vmax.f32 %v2572_v28, %v2574_v31 }
 0x276   :  { %532 = vmax.xlane.f32.xlu1 %v531_v34  ;;  %v2614_v34 = vld [vmem:[%s3466_s2 + $0x8] sm:$0xff] }
 0x277   :  { %1954 = vmatmul.msk.f32.gmra.mxu2 %vm48_vm0, %v2614_v34  ;;  %1959 = vmatmul.msk.f32.gmra.mxu3 %vm48_vm0, %v2614_v34 }
 0x27c   :  { %v2578_v35 = vpop.f32.mrf.mxu0  ;;  %v2580_v38 = vpop.f32.mrf.mxu1 }
 0x27d   :  { %v603_v41 = vmax.f32 %v2578_v35, %v2580_v38 }
 0x27f   :  { %604 = vmax.xlane.f32.xlu2 %v603_v41 }
 0x284   :  { %v2584_v42 = vpop.f32.mrf.mxu0  ;;  %v2586_v43 = vpop.f32.mrf.mxu1 }
 0x285   :  { %v606_v46 = vmax.f32 %v2584_v42, %v2586_v43 }
 0x287   :  { %607 = vmax.xlane.f32.xlu2 %v606_v46 }
 0x28c   :  { %v2590_v49 = vpop.f32.mrf.mxu0  ;;  %v2592_v54 = vpop.f32.mrf.mxu1 }
 0x28d   :  { %v609_v61 = vmax.f32 %v2590_v49, %v2592_v54 }
 0x28f   :  { %610 = vmax.xlane.f32.xlu2 %v609_v61 }
 0x294   :  { %v2605_v13 = vpop.f32.mrf.mxu0  ;;  %v2607_v20 = vpop.f32.mrf.mxu1 }
 0x295   :  { %v612_v27 = vmax.f32 %v2605_v13, %v2607_v20 }
 0x297   :  { %613 = vmax.xlane.f32.xlu2 %v612_v27  ;;  %v2629_v27 = vld [vmem:[%s3466_s2 + $0x10] sm:$0xff] }
 0x298   :  { %1955 = vmatmul.msk.f32.gmra.mxu2 %vm48_vm0, %v2629_v27  ;;  %1960 = vmatmul.msk.f32.gmra.mxu3 %vm48_vm0, %v2629_v27 }
 0x29c   :  { %v2620_v41 = vpop.f32.mrf.mxu0  ;;  %v2622_v46 = vpop.f32.mrf.mxu1 }
 0x29d   :  { %v615_v61 = vmax.f32 %v2620_v41, %v2622_v46 }
 0x29f   :  { %616 = vmax.xlane.f32.xlu0 %v615_v61 }
 0x2a0   :  { %1956 = vmatmul.msk.f32.gmra.mxu2 %vm48_vm0, %v2646_v63  ;;  %1961 = vmatmul.msk.f32.gmra.mxu3 %vm48_vm0, %v2646_v63 }
 0x2a4   :  { %v2635_v53 = vpop.f32.mrf.mxu0  ;;  %v2637_v52 = vpop.f32.mrf.mxu1 }
 0x2a5   :  { %v618_v61 = vmax.f32 %v2635_v53, %v2637_v52 }
 0x2a7   :  { %601 = vmax.xlane.f32.xlu0 %v600_v0  ;;  %619 = vmax.xlane.f32.xlu2 %v618_v61  ;;  %v105_v61 = vld [vmem:[%s3466_s2 + $0x20] sm:$0x1] }
 0x2a8   :  { %1957 = vmatmul.msk.f32.gmra.mxu2 %vm48_vm0, %v105_v61  ;;  %1962 = vmatmul.msk.f32.gmra.mxu3 %vm48_vm0, %v105_v61  ;;  %v591_v61 = vmax.f32 %v2554_v5, %v2556_v9 }
 0x2ac   :  { %v2652_v3 = vpop.f32.mrf.mxu0  ;;  %v2654_v2 = vpop.f32.mrf.mxu1 }
 0x2ad   :  { %v621_v0 = vmax.f32 %v2652_v3, %v2654_v2 }
 0x2af   :  { %595 = vmax.xlane.f32.xlu0 %v594_v12  ;;  %622 = vmax.xlane.f32.xlu2 %v621_v0  ;;  %v582_v12 = vmax.f32 %v2536_v50, %v2538_v51  ;;  %v597_v0 = vmax.f32 %v2566_v21, %v2568_v24 }
 0x2b4   :  { %v2665_v10 = vpop.f32.mrf.mxu0  ;;  %v2667_v19 = vpop.f32.mrf.mxu1 }
 0x2b5   :  { %v624_v23 = vmax.f32 %v2665_v10, %v2667_v19 }
 0x2b7   :  { %589 = vmax.xlane.f32.xlu0 %v588_v18  ;;  %625 = vmax.xlane.f32.xlu2 %v624_v23  ;;  %v107_v18 = vld [vmem:[%s3467_s4 + $0x8] sm:$0xff]  ;;  %v579_v23 = vmax.f32 %v2530_v47, %v2532_v48 }
 0x2bf   :  { %583 = vmax.xlane.f32.xlu0 %v582_v12  ;;  %598 = vmax.xlane.f32.xlu2 %v597_v0  ;;  %v108_v12 = vld [vmem:[%s3467_s4 + $0x10] sm:$0xff]  ;;  %v110_v0 = vld [vmem:[%s3467_s4 + $0x20] sm:$0x1] }
 0x2c7   :  { %592 = vmax.xlane.f32.xlu2 %v591_v61 }
 0x2cf   :  { %586 = vmax.xlane.f32.xlu2 %v585_v22  ;;  %v106_v22 = vld [vmem:[%s3467_s4] sm:$0xff] }
 0x2d3   :  { %118 = vperm.xlu0 %2059, %v107_v18   ;;  %v109_v18 = vld [vmem:[%s3467_s4 + $0x18] sm:$0xff] }
 0x2d7   :  { %580 = vmax.xlane.f32.xlu2 %v579_v23 }
 0x2db   :  { %123 = vperm.xlu0 %2059, %v108_v12  }
 0x2e3   :  { %133 = vperm.xlu0 %2059, %v110_v0  }
 0x2eb   :  { %1006 = vperm.xlu0 %2059, %v2419_v11  }
 0x2ef   :  { %113 = vperm.xlu2 %2060, %v106_v22  }
 0x2f2   :  { %v605_v61 = vpop.xlane.xlu2 %604 }
 0x2f3   :  { %v675_v23 = vsub.f32 %v2578_v35, %v605_v61  ;;  %v676_v12 = vsub.f32 %v2580_v38, %v605_v61 }
 0x2f5   :  { %v787_v26 = vmul.f32 1.442695, %v675_v23  ;;  %v789_v25 = vmul.f32 1.442695, %v676_v12  ;;  %v534_v23 = vmax.f32 %v2452_v56, %v2454_v57 }
 0x2f7   :  { %128 = vperm.xlu2 %2060, %v109_v18   ;;  %2062 = vpow2.f32 %v787_v26 }
 0x2f8   :  { %2064 = vpow2.f32 %v789_v25 }
 0x2fa   :  { %v608_v0 = vpop.xlane.xlu2 %607 }
 0x2fb   :  { %v677_v11 = vsub.f32 %v2584_v42, %v608_v0  ;;  %v678_v30 = vsub.f32 %v2586_v43, %v608_v0  ;;  %v546_v43 = vmax.f32 %v2472_v6, %v2474_v8 }
 0x2fd   :  { %v791_v29 = vmul.f32 1.442695, %v677_v11  ;;  %v793_v22 = vmul.f32 1.442695, %v678_v30  ;;  %v2704_v37 = vpop.eup %2062 }
 0x2fe   :  { %v2706_v35 = vpop.eup %2064 }
 0x2ff   :  { %2066 = vpow2.f32 %v791_v29  ;;  %1001 = vperm.xlu2 %2060, %v2402_v7   ;;  %v567_v7 = vmax.f32 %v2506_v32, %v2508_v33 }
 0x300   :  { %2068 = vpow2.f32 %v793_v22 }
 0x302   :  { %v611_v30 = vpop.xlane.xlu2 %610 }
 0x305   :  { %v2708_v38 = vpop.eup %2066 }
 0x306   :  { %v2710_v61 = vpop.eup %2068 }
 0x30a   :  { %v614_v25 = vpop.xlane.xlu2 %613 }
 0x312   :  { %v617_v33 = vpop.xlane.xlu0 %616 }
 0x315   :  { %568 = vmax.xlane.f32.xlu0 %v567_v7 }
 0x31a   :  { %v620_v29 = vpop.xlane.xlu2 %619 }
 0x31b   :  { %v686_v57 = vsub.f32 %v2637_v52, %v620_v29  ;;  %v682_v52 = vsub.f32 %v2607_v20, %v614_v25 }
 0x31d   :  { %547 = vmax.xlane.f32.xlu0 %v546_v43  ;;  %v685_v43 = vsub.f32 %v2635_v53, %v620_v29 }
 0x322   :  { %v623_v18 = vpop.xlane.xlu2 %622 }
 0x323   :  { %v687_v12 = vsub.f32 %v2652_v3, %v623_v18  ;;  %v688_v0 = vsub.f32 %v2654_v2, %v623_v18  ;;  %v683_v3 = vsub.f32 %v2620_v41, %v617_v33  ;;  %v684_v2 = vsub.f32 %v2622_v46, %v617_v33 }
 0x324   :  { %v807_v18 = vmul.f32 1.442695, %v685_v43  ;;  %v801_v41 = vmul.f32 1.442695, %v682_v52 }
 0x325   :  { %535 = vmax.xlane.f32.xlu0 %v534_v23  ;;  %v811_v22 = vmul.f32 1.442695, %v687_v12  ;;  %v813_v42 = vmul.f32 1.442695, %v688_v0 }
 0x327   :  { %2070 = vpow2.f32 %v811_v22 }
 0x328   :  { %2072 = vpow2.f32 %v813_v42 }
 0x32a   :  { %v626_v11 = vpop.xlane.xlu2 %625 }
 0x32b   :  { %v689_v26 = vsub.f32 %v2665_v10, %v626_v11  ;;  %v690_v7 = vsub.f32 %v2667_v19, %v626_v11  ;;  %v809_v10 = vmul.f32 1.442695, %v686_v57  ;;  %v803_v19 = vmul.f32 1.442695, %v683_v3 }
 0x32c   :  { %v681_v11 = vsub.f32 %v2605_v13, %v614_v25  ;;  %v602_v25 = vpop.xlane.xlu0 %601 }
 0x32d   :  { %v815_v36 = vmul.f32 1.442695, %v689_v26  ;;  %v817_v8 = vmul.f32 1.442695, %v690_v7  ;;  %v2071_v23 = vpop.eup %2070  ;;  %v805_v26 = vmul.f32 1.442695, %v684_v2 }
 0x32e   :  { %v2073_v12 = vpop.eup %2072  ;;  %v799_v57 = vmul.f32 1.442695, %v681_v11  ;;  %v674_v11 = vsub.f32 %v2574_v31, %v602_v25 }
 0x32f   :  { %2074 = vpow2.f32 %v815_v36  ;;  %v679_v36 = vsub.f32 %v2590_v49, %v611_v30 }
 0x330   :  { %2076 = vpow2.f32 %v817_v8  ;;  %v680_v8 = vsub.f32 %v2592_v54, %v611_v30 }
 0x331   :  { %2078 = vpow2.f32 %v807_v18  ;;  %v795_v29 = vmul.f32 1.442695, %v679_v36 }
 0x332   :  { %2080 = vpow2.f32 %v809_v10  ;;  %v797_v22 = vmul.f32 1.442695, %v680_v8  ;;  %v599_v7 = vpop.xlane.xlu2 %598 }
 0x333   :  { %2082 = vpow2.f32 %v803_v19  ;;  %v671_v18 = vsub.f32 %v2566_v21, %v599_v7 }
 0x334   :  { %2084 = vpow2.f32 %v805_v26  ;;  %v673_v26 = vsub.f32 %v2572_v28, %v602_v25 }
 0x335   :  { %v2075_v0 = vpop.eup %2074  ;;  %2086 = vpow2.f32 %v799_v57  ;;  %v779_v52 = vmul.f32 1.442695, %v671_v18  ;;  %v3531_v57 = vpack.c.bf16 %v2708_v38, %v2704_v37 }
 0x336   :  { %v2077_v53 = vpop.eup %2076  ;;  %v855_v42 = vpack.c.bf16 %v2075_v0, %v2071_v23  ;;  %2088 = vpow2.f32 %v801_v41  ;;  %v672_v23 = vsub.f32 %v2568_v24, %v599_v7  ;;  %v783_v36 = vmul.f32 1.442695, %v673_v26 }
 0x337   :  { %v856_v33 = vpack.c.bf16 %v2077_v53, %v2073_v12  ;;  %v2079_v46 = vpop.eup %2078  ;;  %2090 = vpow2.f32 %v795_v29  ;;  %v596_v53 = vpop.xlane.xlu0 %595 }
 0x338   :  { %903 = vmatpush.bf16.xpose.msra.mxu2 %v855_v42  ;;  %v2081_v13 = vpop.eup %2080  ;;  %2092 = vpow2.f32 %v797_v22  ;;  %v781_v42 = vmul.f32 1.442695, %v672_v23  ;;  %v669_v8 = vsub.f32 %v2560_v14, %v596_v53  ;;  %v670_v28 = vsub.f32 %v2562_v17, %v596_v53 }
 0x339   :  { %926 = vmatpush.bf16.xpose.msra.mxu3 %v856_v33  ;;  %v2083_v43 = vpop.eup %2082  ;;  %v785_v33 = vmul.f32 1.442695, %v674_v11  ;;  %2094 = vpow2.f32 %v779_v52  ;;  %v168_v11 = vpop.f32.mrf.mxu2 }
 0x33a   :  { %v2085_v20 = vpop.eup %2084  ;;  %v853_v49 = vpack.c.bf16 %v2079_v46, %v2083_v43  ;;  %v593_v19 = vpop.xlane.xlu2 %592  ;;  %2096 = vpow2.f32 %v781_v42  ;;  %v3532_v46 = vpack.c.bf16 %v2710_v61, %v2706_v35  ;;  %v777_v7 = vmul.f32 1.442695, %v670_v28 }
 0x33b   :  { %v854_v3 = vpack.c.bf16 %v2081_v13, %v2085_v20  ;;  %v2087_v54 = vpop.eup %2086  ;;  %v667_v21 = vsub.f32 %v2554_v5, %v593_v19  ;;  %v668_v24 = vsub.f32 %v2556_v9, %v593_v19  ;;  %2098 = vpow2.f32 %v783_v36 }
 0x33c   :  { %v2089_v30 = vpop.eup %2088  ;;  %2100 = vpow2.f32 %v785_v33  ;;  %v775_v9 = vmul.f32 1.442695, %v669_v8 }
 0x33d   :  { %v2091_v2 = vpop.eup %2090  ;;  %v771_v41 = vmul.f32 1.442695, %v667_v21  ;;  %v773_v29 = vmul.f32 1.442695, %v668_v24 }
 0x33e   :  { %v2093_v10 = vpop.eup %2092  ;;  %v851_v12 = vpack.c.bf16 %v2087_v54, %v2091_v2 }
 0x33f   :  { %v852_v0 = vpack.c.bf16 %v2089_v30, %v2093_v10  ;;  %v590_v5 = vpop.xlane.xlu0 %589  ;;  %v2095_v13 = vpop.eup %2094  ;;  %2102 = vpow2.f32 %v771_v41 }
 0x340   :  { %904 = vmatpush.bf16.xpose.msra.mxu2 %v853_v49  ;;  %v2097_v22 = vpop.eup %2096  ;;  %2104 = vpow2.f32 %v773_v29  ;;  %v665_v20 = vsub.f32 %v2548_v62, %v590_v5  ;;  %v666_v61 = vsub.f32 %v2550_v1, %v590_v5  ;;  %v2001_v29 = vld [vmem:[%s3463_s0 + $0x70] sm:$0xff] }
 0x341   :  { %927 = vmatpush.bf16.xpose.msra.mxu3 %v854_v3  ;;  %v2099_v14 = vpop.eup %2098  ;;  %2106 = vpow2.f32 %v775_v9  ;;  %v171_v28 = vpop.f32.mrf.mxu2 }
 0x342   :  { %v587_v31 = vpop.xlane.xlu2 %586  ;;  %v2101_v43 = vpop.eup %2100  ;;  %v847_v38 = vpack.c.bf16 %v2099_v14, %v2095_v13  ;;  %2108 = vpow2.f32 %v777_v7  ;;  %v767_v30 = vmul.f32 1.442695, %v665_v20  ;;  %v769_v2 = vmul.f32 1.442695, %v666_v61 }
 0x343   :  { %v663_v17 = vsub.f32 %v2542_v55, %v587_v31  ;;  %v664_v37 = vsub.f32 %v2544_v58, %v587_v31  ;;  %v848_v35 = vpack.c.bf16 %v2101_v43, %v2097_v22  ;;  %v1999_v22 = vld [vmem:[%s3463_s0 + $0x60] sm:$0xff] }
 0x345   :  { %v763_v25 = vmul.f32 1.442695, %v663_v17  ;;  %v765_v49 = vmul.f32 1.442695, %v664_v37  ;;  %v2103_v54 = vpop.eup %2102  ;;  %v1997_v17 = vld [vmem:[%s3463_s0 + $0x50] sm:$0xff] }
 0x346   :  { %v2105_v55 = vpop.eup %2104 }
 0x347   :  { %v584_v18 = vpop.xlane.xlu0 %583  ;;  %v2107_v10 = vpop.eup %2106  ;;  %2110 = vpow2.f32 %v763_v25  ;;  %v1995_v25 = vld [vmem:[%s3463_s0 + $0x40] sm:$0xff] }
 0x348   :  { %905 = vmatpush.bf16.xpose.msra.mxu2 %v851_v12  ;;  %v2109_v23 = vpop.eup %2108  ;;  %2112 = vpow2.f32 %v765_v49  ;;  %v845_v19 = vpack.c.bf16 %v2107_v10, %v2103_v54  ;;  %v661_v1 = vsub.f32 %v2536_v50, %v584_v18  ;;  %v662_v26 = vsub.f32 %v2538_v51, %v584_v18  ;;  %v2002_v49 = vld [vmem:[%s3463_s0 + $0x78] sm:$0xff]  ;;  %v1996_v18 = vld [vmem:[%s3463_s0 + $0x48] sm:$0xff] }
 0x349   :  { %928 = vmatpush.bf16.xpose.msra.mxu3 %v852_v0  ;;  %2114 = vpow2.f32 %v767_v30  ;;  %v846_v12 = vpack.c.bf16 %v2109_v23, %v2105_v55  ;;  %v174_v20 = vpop.f32.mrf.mxu2  ;;  %v1998_v30 = vld [vmem:[%s3463_s0 + $0x58] sm:$0xff] }
 0x34a   :  { %v581_v3 = vpop.xlane.xlu2 %580  ;;  %2116 = vpow2.f32 %v769_v2  ;;  %v759_v42 = vmul.f32 1.442695, %v661_v1  ;;  %v761_v33 = vmul.f32 1.442695, %v662_v26 }
 0x34b   :  { %v659_v58 = vsub.f32 %v2530_v47, %v581_v3  ;;  %v660_v62 = vsub.f32 %v2532_v48, %v581_v3  ;;  %v200_v47 = vpop.f32.mrf.mxu3  ;;  %v2000_v3 = vld [vmem:[%s3463_s0 + $0x68] sm:$0xff] }
 0x34d   :  { %v755_v0 = vmul.f32 1.442695, %v659_v58  ;;  %v757_v53 = vmul.f32 1.442695, %v660_v62  ;;  %v2111_v52 = vpop.eup %2110 }
 0x34e   :  { %v2113_v36 = vpop.eup %2112 }
 0x34f   :  { %v2115_v21 = vpop.eup %2114  ;;  %2118 = vpow2.f32 %v755_v0  ;;  %v119_v9 = vpop.permute.xlu0 %118 }
 0x350   :  { %906 = vmatpush.bf16.xpose.msra.mxu2 %v3531_v57  ;;  %v2117_v48 = vpop.eup %2116  ;;  %2120 = vpow2.f32 %v757_v53  ;;  %v843_v24 = vpack.c.bf16 %v2115_v21, %v2111_v52  ;;  %v172_v43 = vadd.f32 %v171_v28, %v119_v9 }
 0x351   :  { %929 = vmatpush.bf16.xpose.msra.mxu3 %v3532_v46  ;;  %2122 = vpow2.f32 %v759_v42  ;;  %v844_v50 = vpack.c.bf16 %v2117_v48, %v2113_v36  ;;  %v177_v55 = vpop.f32.mrf.mxu2  ;;  %v995_v36 = vld [vmem:[%s3465_s1] sm:$0xff] }
 0x352   :  { %2124 = vpow2.f32 %v761_v33  ;;  %v114_v46 = vpop.permute.xlu2 %113  ;;  %v996_v33 = vld [vmem:[%s3465_s1 + $0x8] sm:$0xff] }
 0x353   :  { %v203_v57 = vpop.f32.mrf.mxu3  ;;  %v169_v7 = vadd.f32 %v168_v11, %v114_v46  ;;  %v201_v14 = vadd.f32 %v200_v47, %v114_v46 }
 0x354   :  { %v204_v37 = vadd.f32 %v203_v57, %v119_v9 }
 0x355   :  { %v2119_v51 = vpop.eup %2118 }
 0x356   :  { %v2121_v8 = vpop.eup %2120 }
 0x357   :  { %v2123_v31 = vpop.eup %2122  ;;  %v124_v2 = vpop.permute.xlu0 %123 }
 0x358   :  { %907 = vmatpush.bf16.xpose.msra.mxu2 %v847_v38  ;;  %v2125_v41 = vpop.eup %2124  ;;  %v841_v5 = vpack.c.bf16 %v2123_v31, %v2119_v51  ;;  %v2765_v38 = vpack.c.bf16 %v172_v43, %v169_v7  ;;  %v175_v62 = vadd.f32 %v174_v20, %v124_v2 }
 0x359   :  { %930 = vmatpush.bf16.xpose.msra.mxu3 %v848_v35  ;;  %v842_v13 = vpack.c.bf16 %v2125_v41, %v2121_v8  ;;  %v2767_v35 = vpack.c.bf16 %v204_v37, %v201_v14  ;;  %v180_v26 = vpop.f32.mrf.mxu2 }
 0x35a   :  { %v129_v54 = vpop.permute.xlu2 %128 }
 0x35b   :  { %v206_v61 = vpop.f32.mrf.mxu3  ;;  %v178_v58 = vadd.f32 %v177_v55, %v129_v54 }
 0x35d   :  { %v2786_v1 = vpack.c.bf16 %v178_v58, %v175_v62 }
 0x35f   :  { %v134_v0 = vpop.permute.xlu0 %133 }
 0x360   :  { %908 = vmatpush.bf16.xpose.msra.mxu2 %v845_v19  ;;  %v207_v19 = vadd.f32 %v206_v61, %v124_v2  ;;  %v181_v53 = vadd.f32 %v180_v26, %v134_v0 }
 0x361   :  { %931 = vmatpush.bf16.xpose.msra.mxu3 %v846_v12 }
 0x362   :  { %v2792_v42 = vpack.c.bf16 %v181_v53, %v181_v53  ;;  %v1002_v46 = vpop.permute.xlu2 %1001 }
 0x363   :  { %v209_v10 = vpop.f32.mrf.mxu3 }
 0x364   :  { %v210_v23 = vadd.f32 %v209_v10, %v129_v54 }
 0x366   :  { %v2788_v12 = vpack.c.bf16 %v210_v23, %v207_v19 }
 0x368   :  { %909 = vmatpush.bf16.xpose.msra.mxu2 %v843_v24 }
 0x369   :  { %932 = vmatpush.bf16.xpose.msra.mxu3 %v844_v50 }
 0x36b   :  { %v212_v11 = vpop.f32.mrf.mxu3 }
 0x36c   :  { %v213_v52 = vadd.f32 %v212_v11, %v134_v0 }
 0x36e   :  { %v2794_v47 = vpack.c.bf16 %v213_v52, %v213_v52 }
 0x370   :  { %910 = vmatpush.bf16.xpose.msra.mxu2 %v841_v5 }
 0x371   :  { %933 = vmatpush.bf16.xpose.msra.mxu3 %v842_v13 }
 0x377   :  { %911 = vmatmul.bf16.vlgmr.msra.gmra.mxu2 %v2765_v38 }
 0x378   :  { %1027 = vmatpush.msrb.mxu2 %v2001_v29  ;;  %934 = vmatmul.bf16.vlgmr.msra.gmra.mxu3 %v2767_v35 }
 0x379   :  { %1050 = vmatpush.msrb.mxu3 %v2002_v49 }
 0x37a   :  { %1028 = vmatpush.msrb.mxu2 %v1999_v22 }
 0x37b   :  { %1051 = vmatpush.msrb.mxu3 %v2000_v3 }
 0x37c   :  { %1029 = vmatpush.msrb.mxu2 %v1997_v17 }
 0x37d   :  { %1052 = vmatpush.msrb.mxu3 %v1998_v30 }
 0x37e   :  { %1030 = vmatpush.msrb.mxu2 %v1995_v25 }
 0x37f   :  { %1053 = vmatpush.msrb.mxu3 %v1996_v18 }
 0x380   :  { %1123 = vmatpush.msra.mxu2 %v2001_v29 }
 0x381   :  { %1155 = vmatpush.msra.mxu3 %v2002_v49  ;;  %v1065_v49 = vld [vmem:[%s3466_s2 + $0x20] sm:$0x1] }
 0x382   :  { %1124 = vmatpush.msra.mxu2 %v1999_v22  ;;  %v1007_v22 = vpop.permute.xlu0 %1006 }
 0x383   :  { %1156 = vmatpush.msra.mxu3 %v2000_v3 }
 0x384   :  { %1125 = vmatpush.msra.mxu2 %v1997_v17 }
 0x385   :  { %1157 = vmatpush.msra.mxu3 %v1998_v30 }
 0x386   :  { %1126 = vmatpush.msra.mxu2 %v1995_v25 }
 0x387   :  { %916 = vmatmul.bf16.gmra.mxu2 %v2786_v1  ;;  %1158 = vmatpush.msra.mxu3 %v1996_v18 }
 0x388   :  { %939 = vmatmul.bf16.gmra.mxu3 %v2788_v12 }
 0x38a   :  { %v2855_v11 = vpop.xlane.xlu0 %568 }
 0x397   :  { %921 = vmatmul.bf16.gmra.mxu2 %v2792_v42 }
 0x398   :  { %944 = vmatmul.bf16.gmra.mxu3 %v2794_v47 }
 0x3a7   :  { %2003 = vmatmul.msk.f32.vlgmr.msrb.gmra.mxu2 %vm48_vm0, %v995_v36 }
 0x3a8   :  { %2005 = vmatmul.msk.f32.vlgmr.msrb.gmra.mxu3 %vm48_vm0, %v995_v36  ;;  %v2859_v36 = vpop.xlane.xlu0 %547 }
 0x3af   :  { %2004 = vmatmul.msk.f32.gmra.mxu2 %vm48_vm0, %v996_v33 }
 0x3b0   :  { %2006 = vmatmul.msk.f32.gmra.mxu3 %vm48_vm0, %v996_v33  ;;  %v576_v33 = vmax.f32 %v2524_v44, %v2526_v45 }
 0x3b7   :  { %2007 = vmatmul.msk.f32.vlgmr.msra.gmra.mxu2 %vm48_vm0, %v2599_v4 }
 0x3b8   :  { %2012 = vmatmul.msk.f32.vlgmr.msra.gmra.mxu3 %vm48_vm0, %v2599_v4 }
 0x3bf   :  { %2008 = vmatmul.msk.f32.gmra.mxu2 %vm48_vm0, %v2614_v34 }
 0x3c0   :  { %2013 = vmatmul.msk.f32.gmra.mxu3 %vm48_vm0, %v2614_v34 }
 0x3c7   :  { %2009 = vmatmul.msk.f32.gmra.mxu2 %vm48_vm0, %v2629_v27 }
 0x3c8   :  { %2014 = vmatmul.msk.f32.gmra.mxu3 %vm48_vm0, %v2629_v27 }
 0x3cf   :  { %2010 = vmatmul.msk.f32.gmra.mxu2 %vm48_vm0, %v2646_v63 }
 0x3d0   :  { %2015 = vmatmul.msk.f32.gmra.mxu3 %vm48_vm0, %v2646_v63 }
 0x3d7   :  { %2011 = vmatmul.msk.f32.gmra.mxu2 %vm48_vm0, %v1065_v49 }
 0x3d8   :  { %2016 = vmatmul.msk.f32.gmra.mxu3 %vm48_vm0, %v1065_v49 }
 0x3fa   :  { %v2824_v21 = vpop.f32.mrf.mxu2 }
 0x3fb   :  { %3533 = vst [vmem:[#allocation24_spill] sm:$0xff] %v2824_v21  ;;  %v2826_v4 = vpop.f32.mrf.mxu3 }
 0x3fc   :  { %3534 = vst [vmem:[#allocation25_spill] sm:$0xff] %v2826_v4 }
 0x402   :  { %v914_v48 = vpop.f32.mrf.mxu2 }
 0x403   :  { %v937_v24 = vpop.f32.mrf.mxu3 }
 0x404   :  { %v2828_v50 = vadd.f32 %v937_v24, %v914_v48  ;;  %v552_v24 = vmax.f32 %v2482_v15, %v2484_v16 }
 0x406   :  { %3535 = vst [vmem:[#allocation26_spill] sm:$0xff] %v2828_v50  ;;  %v651_v50 = vsub.f32 %v2506_v32, %v2855_v11 }
 0x408   :  { %v739_v32 = vmul.f32 1.442695, %v651_v50 }
 0x40a   :  { %v2830_v34 = vpop.f32.mrf.mxu2 }
 0x40b   :  { %3536 = vst [vmem:[#allocation27_spill] sm:$0xff] %v2830_v34  ;;  %v2832_v51 = vpop.f32.mrf.mxu3 }
 0x40c   :  { %3537 = vst [vmem:[#allocation28_spill] sm:$0xff] %v2832_v51 }
 0x412   :  { %v919_v8 = vpop.f32.mrf.mxu2 }
 0x413   :  { %v942_v27 = vpop.f32.mrf.mxu3 }
 0x414   :  { %v2834_v28 = vadd.f32 %v942_v27, %v919_v8  ;;  %v2865_v8 = vpop.xlane.xlu0 %535 }
 0x416   :  { %3538 = vst [vmem:[#allocation29_spill] sm:$0xff] %v2834_v28 }
 0x41a   :  { %v2836_v31 = vpop.f32.mrf.mxu2 }
 0x41b   :  { %3539 = vst [vmem:[#allocation30_spill] sm:$0xff] %v2836_v31  ;;  %v2838_v57 = vpop.f32.mrf.mxu3 }
 0x41c   :  { %3540 = vst [vmem:[#allocation31_spill] sm:$0xff] %v2838_v57 }
 0x422   :  { %v924_v63 = vpop.f32.mrf.mxu2 }
 0x423   :  { %v947_v41 = vpop.f32.mrf.mxu3 }
 0x42a   :  { %v1032_v5 = vpop.f32.mrf.mxu2 }
 0x42b   :  { %v1033_v29 = vadd.f32 %v1032_v5, %v1002_v46  ;;  %v1055_v13 = vpop.f32.mrf.mxu3  ;;  %v537_v5 = vmax.f32 %v2456_v59, %v2458_v60 }
 0x42c   :  { %v1056_v9 = vadd.f32 %v1055_v13, %v1002_v46 }
 0x42d   :  { %1175 = vxpose.xlu2.b32.start.end [1/1] (short) %v1033_v29, 128 }
 0x42e   :  { %1207 = vxpose.xlu0.b32.start.end [1/1] (short) %v1056_v9, 128 }
 0x432   :  { %v1035_v7 = vpop.f32.mrf.mxu2 }
 0x433   :  { %v1036_v14 = vadd.f32 %v1035_v7, %v1007_v22  ;;  %v1058_v17 = vpop.f32.mrf.mxu3 }
 0x434   :  { %v1059_v43 = vadd.f32 %v1058_v17, %v1007_v22 }
 0x435   :  { %v1255_v37 = vpack.c.bf16 %v1036_v14, %v1036_v14 }
 0x436   :  { %v1256_v20 = vpack.c.bf16 %v1059_v43, %v1059_v43 }
 0x437   :  { %v1306_v61 = vsel %vm346_vm1, %v1255_v37, 0 }
 0x438   :  { %v1309_v25 = vsel %vm346_vm1, %v1256_v20, 0  ;;  %1318 = vmatpush.bf16.msrb.mxu2 %v1306_v61 }
 0x439   :  { %1407 = vmatpush.bf16.msrb.mxu3 %v1309_v25 }
 0x43a   :  { %v2869_v41 = vpop.f32.mrf.mxu2 }
 0x43b   :  { %3541 = vst [vmem:[#allocation32_spill] sm:$0xff] %v2869_v41  ;;  %v2871_v46 = vpop.f32.mrf.mxu3 }
 0x43c   :  { %3542 = vst [vmem:[#allocation33_spill] sm:$0xff] %v2871_v46 }
 0x442   :  { %v2875_v9 = vpop.f32.mrf.mxu2 }
 0x443   :  { %3543 = vst [vmem:[#allocation34_spill] sm:$0xff] %v2875_v9  ;;  %v2877_v22 = vpop.f32.mrf.mxu3 }
 0x444   :  { %3544 = vst [vmem:[#allocation35_spill] sm:$0xff] %v2877_v22 }
 0x44a   :  { %v2881_v43 = vpop.f32.mrf.mxu2 }
 0x44b   :  { %3545 = vst [vmem:[#allocation36_spill] sm:$0xff] %v2881_v43  ;;  %v2883_v20 = vpop.f32.mrf.mxu3 }
 0x44c   :  { %3546 = vst [vmem:[#allocation37_spill] sm:$0xff] %v2883_v20 }
 0x4c6   :  { %v1191_v3 = vpop.trf.xlu2 }
 0x4ce   :  { %v1192_v54 = vpop.trf.xlu2 }
 0x4cf   :  { %v1239_v30 = vpack.c.bf16 %v1192_v54, %v1191_v3  ;;  %v2885_v3 = vpop.f32.mrf.mxu2  ;;  %v2887_v54 = vpop.f32.mrf.mxu3 }
 0x4d0   :  { %3547 = vst [vmem:[#allocation38_spill] sm:$0xff] %v2885_v3 }
 0x4d1   :  { %2017 = vmatmul.msk.bf16.vlgmr.msrb.gmra.mxu2 %vm297_vm2, %v1239_v30  ;;  %2033 = vmatmul.msk.bf16.vlgmr.msrb.gmra.mxu3 %vm297_vm2, %v1239_v30  ;;  %3548 = vst [vmem:[#allocation39_spill] sm:$0xff] %v2887_v54 }
 0x4d2   :  { %v1223_v29 = vpop.trf.xlu0 }
 0x4d6   :  { %v1193_v55 = vpop.trf.xlu2 }
 0x4da   :  { %v1224_v17 = vpop.trf.xlu0 }
 0x4de   :  { %v1194_v2 = vpop.trf.xlu2 }
 0x4df   :  { %v1240_v18 = vpack.c.bf16 %v1194_v2, %v1193_v55  ;;  %v2891_v55 = vpop.f32.mrf.mxu2  ;;  %v2893_v2 = vpop.f32.mrf.mxu3 }
 0x4e0   :  { %3549 = vst [vmem:[#allocation40_spill] sm:$0xff] %v2891_v55 }
 0x4e1   :  { %2018 = vmatmul.msk.bf16.gmra.mxu2 %vm297_vm2, %v1240_v18  ;;  %2034 = vmatmul.msk.bf16.gmra.mxu3 %vm297_vm2, %v1240_v18  ;;  %3550 = vst [vmem:[#allocation41_spill] sm:$0xff] %v2893_v2 }
 0x4e2   :  { %v1225_v61 = vpop.trf.xlu0 }
 0x4e6   :  { %v1195_v10 = vpop.trf.xlu2 }
 0x4ea   :  { %v1226_v30 = vpop.trf.xlu0 }
 0x4ee   :  { %v1196_v58 = vpop.trf.xlu2 }
 0x4ef   :  { %v1241_v23 = vpack.c.bf16 %v1196_v58, %v1195_v10  ;;  %v1247_v10 = vpack.c.bf16 %v1224_v17, %v1223_v29 }
 0x4f1   :  { %2019 = vmatmul.msk.bf16.gmra.mxu2 %vm297_vm2, %v1241_v23  ;;  %2035 = vmatmul.msk.bf16.gmra.mxu3 %vm297_vm2, %v1241_v23 }
 0x4f2   :  { %v1227_v18 = vpop.trf.xlu0 }
 0x4f6   :  { %v1197_v62 = vpop.trf.xlu2 }
 0x4fe   :  { %v1198_v19 = vpop.trf.xlu2 }
 0x4ff   :  { %v1242_v26 = vpack.c.bf16 %v1198_v19, %v1197_v62  ;;  %v1228_v62 = vpop.trf.xlu0 }
 0x501   :  { %2020 = vmatmul.msk.bf16.gmra.mxu2 %vm297_vm2, %v1242_v26  ;;  %2036 = vmatmul.msk.bf16.gmra.mxu3 %vm297_vm2, %v1242_v26 }
 0x506   :  { %v1199_v0 = vpop.trf.xlu2 }
 0x50e   :  { %v1200_v53 = vpop.trf.xlu2 }
 0x50f   :  { %v1243_v52 = vpack.c.bf16 %v1200_v53, %v1199_v0  ;;  %v575_v0 = vpop.xlane.xlu1 %574  ;;  %v1248_v53 = vpack.c.bf16 %v1226_v30, %v1225_v61 }
 0x511   :  { %2021 = vmatmul.msk.bf16.gmra.mxu2 %vm297_vm2, %v1243_v52  ;;  %2037 = vmatmul.msk.bf16.gmra.mxu3 %vm297_vm2, %v1243_v52  ;;  %v1229_v52 = vpop.trf.xlu0 }
 0x516   :  { %577 = vmax.xlane.f32.xlu2 %v576_v33  ;;  %v1201_v48 = vpop.trf.xlu2 }
 0x51e   :  { %553 = vmax.xlane.f32.xlu2 %v552_v24  ;;  %v1202_v27 = vpop.trf.xlu2 }
 0x51f   :  { %v1244_v63 = vpack.c.bf16 %v1202_v27, %v1201_v48  ;;  %v572_v27 = vpop.xlane.xlu1 %571 }
 0x521   :  { %2022 = vmatmul.msk.bf16.gmra.mxu2 %vm297_vm2, %v1244_v63  ;;  %2038 = vmatmul.msk.bf16.gmra.mxu3 %vm297_vm2, %v1244_v63  ;;  %v1230_v63 = vpop.trf.xlu0 }
 0x526   :  { %538 = vmax.xlane.f32.xlu2 %v537_v5  ;;  %v1203_v13 = vpop.trf.xlu2 }
 0x529   :  { %v1231_v61 = vpop.trf.xlu0 }
 0x52e   :  { %v1204_v7 = vpop.trf.xlu2 }
 0x52f   :  { %v1245_v14 = vpack.c.bf16 %v1204_v7, %v1203_v13  ;;  %v1249_v13 = vpack.c.bf16 %v1228_v62, %v1227_v18  ;;  %v2919_v7 = vpop.xlane.xlu1 %562 }
 0x531   :  { %2023 = vmatmul.msk.bf16.gmra.mxu2 %vm297_vm2, %v1245_v14  ;;  %2039 = vmatmul.msk.bf16.gmra.mxu3 %vm297_vm2, %v1245_v14  ;;  %v1232_v62 = vpop.trf.xlu0 }
 0x536   :  { %v1205_v37 = vpop.trf.xlu2 }
 0x537   :  { %v2931_v30 = vpop.xlane.xlu1 %565 }
 0x539   :  { %v2947_v28 = vpop.trf.xlu0 }
 0x53e   :  { %v1206_v25 = vpop.trf.xlu2 }
 0x53f   :  { %v1246_v49 = vpack.c.bf16 %v1206_v25, %v1205_v37  ;;  %v2945_v55 = vpop.xlane.xlu1 %556 }
 0x541   :  { %2024 = vmatmul.msk.bf16.gmra.mxu2 %vm297_vm2, %v1246_v49  ;;  %2040 = vmatmul.msk.bf16.gmra.mxu3 %vm297_vm2, %v1246_v49  ;;  %v1234_v57 = vpop.trf.xlu0 }
 0x551   :  { %2025 = vmatmul.msk.bf16.gmra.mxu2 %vm297_vm2, %v1247_v10  ;;  %2041 = vmatmul.msk.bf16.gmra.mxu3 %vm297_vm2, %v1247_v10  ;;  %v1250_v10 = vpack.c.bf16 %v1230_v63, %v1229_v52 }
 0x554   :  { %v2897_v58 = vpop.f32.mrf.mxu2  ;;  %v2899_v23 = vpop.f32.mrf.mxu3 }
 0x55c   :  { %v2901_v19 = vpop.f32.mrf.mxu2  ;;  %v2903_v26 = vpop.f32.mrf.mxu3 }
 0x561   :  { %2026 = vmatmul.msk.bf16.gmra.mxu2 %vm297_vm2, %v1248_v53  ;;  %2042 = vmatmul.msk.bf16.gmra.mxu3 %vm297_vm2, %v1248_v53  ;;  %v655_v53 = vsub.f32 %v2516_v39, %v575_v0 }
 0x563   :  { %v747_v52 = vmul.f32 1.442695, %v655_v53 }
 0x564   :  { %v2907_v33 = vpop.f32.mrf.mxu2  ;;  %v2909_v48 = vpop.f32.mrf.mxu3 }
 0x565   :  { %v1495_v24 = vmax.f32 %v2907_v33, %v2909_v48  ;;  %2126 = vpow2.f32 %v747_v52 }
 0x567   :  { %1496 = vmax.xlane.f32.xlu1 %v1495_v24 }
 0x56c   :  { %v2913_v5 = vpop.f32.mrf.mxu2  ;;  %v2915_v29 = vpop.f32.mrf.mxu3 }
 0x571   :  { %2027 = vmatmul.msk.bf16.gmra.mxu2 %vm297_vm2, %v1249_v13  ;;  %2043 = vmatmul.msk.bf16.gmra.mxu3 %vm297_vm2, %v1249_v13 }
 0x574   :  { %v2921_v14 = vpop.f32.mrf.mxu2  ;;  %v2923_v17 = vpop.f32.mrf.mxu3 }
 0x575   :  { %v1501_v37 = vmax.f32 %v2921_v14, %v2923_v17 }
 0x577   :  { %1502 = vmax.xlane.f32.xlu0 %v1501_v37  ;;  %v656_v37 = vsub.f32 %v2518_v40, %v575_v0 }
 0x579   :  { %v749_v63 = vmul.f32 1.442695, %v656_v37 }
 0x57b   :  { %2128 = vpow2.f32 %v749_v63  ;;  %v2127_v63 = vpop.eup %2126 }
 0x57c   :  { %v2927_v25 = vpop.f32.mrf.mxu2  ;;  %v2929_v49 = vpop.f32.mrf.mxu3 }
 0x57d   :  { %v1504_v18 = vmax.f32 %v2927_v25, %v2929_v49 }
 0x57f   :  { %1505 = vmax.xlane.f32.xlu2 %v1504_v18 }
 0x581   :  { %2028 = vmatmul.msk.bf16.gmra.mxu2 %vm297_vm2, %v1250_v10  ;;  %2044 = vmatmul.msk.bf16.gmra.mxu3 %vm297_vm2, %v1250_v10 }
 0x584   :  { %v2938_v24 = vpop.f32.mrf.mxu2  ;;  %v2940_v13 = vpop.f32.mrf.mxu3 }
 0x585   :  { %v1507_v2 = vmax.f32 %v2938_v24, %v2940_v13 }
 0x587   :  { %1508 = vmax.xlane.f32.xlu2 %v1507_v2  ;;  %v3551_v2 = vld [vmem:[#allocation21_spill] sm:$0xff] }
 0x588   :  { %v652_v53 = vsub.f32 %v3551_v2, %v2855_v11  ;;  %v2129_v2 = vpop.eup %2128 }
 0x589   :  { %v578_v18 = vpop.xlane.xlu2 %577 }
 0x58a   :  { %v657_v10 = vsub.f32 %v2524_v44, %v578_v18  ;;  %v658_v39 = vsub.f32 %v2526_v45, %v578_v18  ;;  %v3552_v44 = vld [vmem:[#allocation22_spill] sm:$0xff]  ;;  %v3553_v45 = vld [vmem:[#allocation23_spill] sm:$0xff]  ;;  %v1251_v18 = vpack.c.bf16 %v1232_v62, %v1231_v61  ;;  %v3555_v62 = vld [vmem:[#allocation20_spill] sm:$0xff] }
 0x58b   :  { %v653_v4 = vsub.f32 %v3552_v44, %v572_v27  ;;  %v654_v52 = vsub.f32 %v3553_v45, %v572_v27 }
 0x58c   :  { %v751_v40 = vmul.f32 1.442695, %v657_v10  ;;  %v753_v0 = vmul.f32 1.442695, %v658_v39  ;;  %v2953_v51 = vpop.f32.mrf.mxu2  ;;  %v2955_v34 = vpop.f32.mrf.mxu3  ;;  %v741_v39 = vmul.f32 1.442695, %v652_v53 }
 0x58d   :  { %v1510_v37 = vmax.f32 %v2953_v51, %v2955_v34  ;;  %v560_v10 = vpop.xlane.xlu1 %559  ;;  %v743_v11 = vmul.f32 1.442695, %v653_v4  ;;  %v745_v21 = vmul.f32 1.442695, %v654_v52 }
 0x58e   :  { %2130 = vpow2.f32 %v751_v40  ;;  %v3554_v40 = vld [vmem:[#allocation19_spill] sm:$0xff] }
 0x58f   :  { %2132 = vpow2.f32 %v753_v0  ;;  %1511 = vmax.xlane.f32.xlu1 %v1510_v37  ;;  %v649_v44 = vsub.f32 %v3554_v40, %v2931_v30  ;;  %v650_v0 = vsub.f32 %v3555_v62, %v2931_v30  ;;  %v3556_v37 = vld [vmem:[#allocation17_spill] sm:$0xff] }
 0x590   :  { %2134 = vpow2.f32 %v739_v32  ;;  %v647_v45 = vsub.f32 %v3556_v37, %v2919_v7 }
 0x591   :  { %2029 = vmatmul.msk.bf16.gmra.mxu2 %vm297_vm2, %v1251_v18  ;;  %2045 = vmatmul.msk.bf16.gmra.mxu3 %vm297_vm2, %v1251_v18  ;;  %2136 = vpow2.f32 %v741_v39  ;;  %v3557_v18 = vld [vmem:[#allocation18_spill] sm:$0xff]  ;;  %v735_v40 = vmul.f32 1.442695, %v649_v44  ;;  %v737_v20 = vmul.f32 1.442695, %v650_v0  ;;  %v1235_v44 = vpop.trf.xlu0 }
 0x592   :  { %2138 = vpow2.f32 %v743_v11  ;;  %v648_v32 = vsub.f32 %v3557_v18, %v2919_v7  ;;  %v731_v39 = vmul.f32 1.442695, %v647_v45  ;;  %v3559_v7 = vld [vmem:[#allocation16_spill] sm:$0xff]  ;;  %v3561_v18 = vld [vmem:[#allocation14_spill] sm:$0xff] }
 0x593   :  { %2140 = vpow2.f32 %v745_v21 }
 0x594   :  { %v2131_v31 = vpop.eup %2130  ;;  %v2967_v27 = vpop.f32.mrf.mxu2  ;;  %v733_v43 = vmul.f32 1.442695, %v648_v32  ;;  %2142 = vpow2.f32 %v735_v40  ;;  %v644_v32 = vsub.f32 %v3561_v18, %v2945_v55  ;;  %v1252_v40 = vpack.c.bf16 %v1234_v57, %v2947_v28 }
 0x595   :  { %v2969_v61 = vpop.f32.mrf.mxu3  ;;  %v2133_v50 = vpop.eup %2132  ;;  %v839_v53 = vpack.c.bf16 %v2131_v31, %v2127_v63  ;;  %v3558_v63 = vld [vmem:[#allocation15_spill] sm:$0xff]  ;;  %2144 = vpow2.f32 %v737_v20 }
 0x596   :  { %v1513_v4 = vmax.f32 %v2967_v27, %v2969_v61  ;;  %v840_v52 = vpack.c.bf16 %v2133_v50, %v2129_v2  ;;  %v2135_v30 = vpop.eup %2134  ;;  %v551_v54 = vpop.xlane.xlu1 %550  ;;  %v645_v11 = vsub.f32 %v3558_v63, %v560_v10  ;;  %v646_v50 = vsub.f32 %v3559_v7, %v560_v10 }
 0x597   :  { %857 = vmatpush.bf16.xpose.msrb.mxu0 %v839_v53  ;;  %v2137_v62 = vpop.eup %2136  ;;  %2146 = vpow2.f32 %v731_v39  ;;  %v3560_v53 = vld [vmem:[#allocation13_spill] sm:$0xff]  ;;  %v554_v63 = vpop.xlane.xlu2 %553 }
 0x598   :  { %1514 = vmax.xlane.f32.xlu1 %v1513_v4  ;;  %880 = vmatpush.bf16.xpose.msrb.mxu1 %v840_v52  ;;  %v2139_v31 = vpop.eup %2138  ;;  %v643_v45 = vsub.f32 %v3560_v53, %v2945_v55  ;;  %2148 = vpow2.f32 %v733_v43  ;;  %v727_v20 = vmul.f32 1.442695, %v645_v11  ;;  %v729_v10 = vmul.f32 1.442695, %v646_v50 }
 0x599   :  { %v2141_v2 = vpop.eup %2140  ;;  %v837_v4 = vpack.c.bf16 %v2139_v31, %v2135_v30  ;;  %v641_v55 = vsub.f32 %v2482_v15, %v554_v63  ;;  %v642_v11 = vsub.f32 %v2484_v16, %v554_v63  ;;  %v1236_v18 = vpop.trf.xlu0 }
 0x59a   :  { %v838_v52 = vpack.c.bf16 %v2141_v2, %v2137_v62  ;;  %v2143_v30 = vpop.eup %2142  ;;  %v723_v39 = vmul.f32 1.442695, %v643_v45  ;;  %v725_v62 = vmul.f32 1.442695, %v644_v32  ;;  %2150 = vpow2.f32 %v727_v20 }
 0x59b   :  { %v2145_v31 = vpop.eup %2144  ;;  %2152 = vpow2.f32 %v729_v10  ;;  %v719_v32 = vmul.f32 1.442695, %v641_v55 }
 0x59c   :  { %v2980_v37 = vpop.f32.mrf.mxu2  ;;  %2154 = vpow2.f32 %v723_v39 }
 0x59d   :  { %v2982_v21 = vpop.f32.mrf.mxu3  ;;  %v2147_v43 = vpop.eup %2146  ;;  %2156 = vpow2.f32 %v725_v62  ;;  %v3564_v62 = vld [vmem:[#allocation10_spill] sm:$0xff] }
 0x59e   :  { %v1516_v0 = vmax.f32 %v2980_v37, %v2982_v21  ;;  %v2149_v57 = vpop.eup %2148  ;;  %v835_v50 = vpack.c.bf16 %v2143_v30, %v2147_v43  ;;  %v545_v53 = vpop.xlane.xlu1 %544  ;;  %v637_v30 = vsub.f32 %v2472_v6, %v2859_v36  ;;  %2158 = vpow2.f32 %v719_v32  ;;  %v3566_v6 = vld [vmem:[#allocation9_spill] sm:$0xff] }
 0x59f   :  { %858 = vmatpush.bf16.xpose.msrb.mxu0 %v837_v4  ;;  %v836_v45 = vpack.c.bf16 %v2145_v31, %v2149_v57  ;;  %v638_v43 = vsub.f32 %v3564_v62, %v2859_v36  ;;  %v539_v36 = vpop.xlane.xlu2 %538 }
 0x5a0   :  { %1517 = vmax.xlane.f32.xlu0 %v1516_v0  ;;  %881 = vmatpush.bf16.xpose.msrb.mxu1 %v838_v52  ;;  %v3562_v0 = vld [vmem:[#allocation11_spill] sm:$0xff]  ;;  %v3563_v52 = vld [vmem:[#allocation12_spill] sm:$0xff]  ;;  %v2151_v20 = vpop.eup %2150 }
 0x5a1   :  { %2030 = vmatmul.msk.bf16.gmra.mxu2 %vm297_vm2, %v1252_v40  ;;  %2046 = vmatmul.msk.bf16.gmra.mxu3 %vm297_vm2, %v1252_v40  ;;  %v639_v4 = vsub.f32 %v3562_v0, %v551_v54  ;;  %v640_v15 = vsub.f32 %v3563_v52, %v551_v54  ;;  %v721_v40 = vmul.f32 1.442695, %v642_v11  ;;  %v2153_v10 = vpop.eup %2152  ;;  %v3565_v11 = vld [vmem:[#allocation8_spill] sm:$0xff]  ;;  %v636_v0 = vsub.f32 %v3566_v6, %v545_v53  ;;  %v1237_v32 = vpop.trf.xlu0 }
 0x5a2   :  { %v2155_v3 = vpop.eup %2154  ;;  %v711_v52 = vmul.f32 1.442695, %v637_v30  ;;  %v632_v30 = vsub.f32 %v2458_v60, %v539_v36 }
 0x5a3   :  { %v715_v16 = vmul.f32 1.442695, %v639_v4  ;;  %v717_v63 = vmul.f32 1.442695, %v640_v15  ;;  %v2157_v54 = vpop.eup %2156  ;;  %2160 = vpow2.f32 %v721_v40  ;;  %v833_v57 = vpack.c.bf16 %v2151_v20, %v2155_v3 }
 0x5a4   :  { %v2995_v2 = vpop.f32.mrf.mxu2  ;;  %v1253_v4 = vpack.c.bf16 %v1236_v18, %v1235_v44  ;;  %v713_v15 = vmul.f32 1.442695, %v638_v43  ;;  %v2159_v3 = vpop.eup %2158  ;;  %v631_v44 = vsub.f32 %v2456_v59, %v539_v36  ;;  %v3567_v43 = vld [vmem:[#allocation6_spill] sm:$0xff] }
 0x5a5   :  { %v2997_v28 = vpop.f32.mrf.mxu3  ;;  %2162 = vpow2.f32 %v715_v16  ;;  %v709_v16 = vmul.f32 1.442695, %v636_v0 }
 0x5a6   :  { %v1519_v7 = vmax.f32 %v2995_v2, %v2997_v28  ;;  %2164 = vpow2.f32 %v717_v63  ;;  %v699_v59 = vmul.f32 1.442695, %v631_v44  ;;  %v1492_v44 = vmax.f32 %v2901_v19, %v2903_v26 }
 0x5a7   :  { %859 = vmatpush.bf16.xpose.msrb.mxu0 %v835_v50  ;;  %v834_v50 = vpack.c.bf16 %v2153_v10, %v2157_v54  ;;  %2166 = vpow2.f32 %v711_v52 }
 0x5a8   :  { %1520 = vmax.xlane.f32.xlu0 %v1519_v7  ;;  %882 = vmatpush.bf16.xpose.msrb.mxu1 %v836_v45  ;;  %v635_v7 = vsub.f32 %v3565_v11, %v545_v53  ;;  %v542_v45 = vpop.xlane.xlu1 %541  ;;  %2168 = vpow2.f32 %v713_v15  ;;  %v3568_v11 = vld [vmem:[#allocation7_spill] sm:$0xff] }
 0x5a9   :  { %v2161_v20 = vpop.eup %2160  ;;  %v1238_v15 = vpop.trf.xlu0 }
 0x5aa   :  { %v707_v40 = vmul.f32 1.442695, %v635_v7  ;;  %v634_v7 = vsub.f32 %v3568_v11, %v542_v45 }
 0x5ab   :  { %v2163_v10 = vpop.eup %2162 }
 0x5ac   :  { %v3006_v39 = vpop.f32.mrf.mxu2  ;;  %v2165_v63 = vpop.eup %2164  ;;  %v831_v62 = vpack.c.bf16 %v2159_v3, %v2163_v10  ;;  %2170 = vpow2.f32 %v707_v40  ;;  %v705_v60 = vmul.f32 1.442695, %v634_v7  ;;  %v629_v3 = vsub.f32 %v2452_v56, %v2865_v8 }
 0x5ad   :  { %v3008_v31 = vpop.f32.mrf.mxu3  ;;  %2172 = vpow2.f32 %v709_v16  ;;  %v2167_v6 = vpop.eup %2166  ;;  %v3569_v16 = vld [vmem:[#allocation5_spill] sm:$0xff] }
 0x5ae   :  { %v1522_v55 = vmax.f32 %v3006_v39, %v3008_v31  ;;  %2174 = vpow2.f32 %v699_v59  ;;  %v630_v10 = vsub.f32 %v3569_v16, %v2865_v8  ;;  %v695_v11 = vmul.f32 1.442695, %v629_v3 }
 0x5af   :  { %860 = vmatpush.bf16.xpose.msrb.mxu0 %v833_v57  ;;  %v832_v57 = vpack.c.bf16 %v2161_v20, %v2165_v63 }
 0x5b0   :  { %1523 = vmax.xlane.f32.xlu2 %v1522_v55  ;;  %883 = vmatpush.bf16.xpose.msrb.mxu1 %v834_v50  ;;  %v633_v55 = vsub.f32 %v3567_v43, %v542_v45  ;;  %v701_v50 = vmul.f32 1.442695, %v632_v30  ;;  %v533_v52 = vpop.xlane.xlu1 %532  ;;  %v3570_v30 = vld [vmem:[#allocation3_spill] sm:$0xff]  ;;  %v3571_v43 = vld [vmem:[#allocation4_spill] sm:$0xff]  ;;  %v697_v8 = vmul.f32 1.442695, %v630_v10 }
 0x5b1   :  { %2031 = vmatmul.msk.bf16.gmra.mxu2 %vm297_vm2, %v1253_v4  ;;  %2047 = vmatmul.msk.bf16.gmra.mxu3 %vm297_vm2, %v1253_v4  ;;  %v2169_v4 = vpop.eup %2168 }
 0x5b2   :  { %v703_v0 = vmul.f32 1.442695, %v633_v55  ;;  %v2171_v36 = vpop.eup %2170  ;;  %2176 = vpow2.f32 %v701_v50  ;;  %v628_v55 = vsub.f32 %v3571_v43, %v533_v52 }
 0x5b3   :  { %v2173_v45 = vpop.eup %2172  ;;  %v829_v56 = vpack.c.bf16 %v2167_v6, %v2171_v36 }
 0x5b4   :  { %v3019_v53 = vpop.f32.mrf.mxu2  ;;  %2178 = vpow2.f32 %v703_v0  ;;  %v2175_v7 = vpop.eup %2174  ;;  %v693_v0 = vmul.f32 1.442695, %v628_v55 }
 0x5b5   :  { %v3021_v18 = vpop.f32.mrf.mxu3  ;;  %2180 = vpow2.f32 %v705_v60 }
 0x5b6   :  { %v1525_v54 = vmax.f32 %v3019_v53, %v3021_v18  ;;  %2182 = vpow2.f32 %v695_v11  ;;  %v2326_v11 = vld [vmem:[%s3467_s4] sm:$0xff] }
 0x5b7   :  { %861 = vmatpush.bf16.xpose.msrb.mxu0 %v831_v62  ;;  %v830_v62 = vpack.c.bf16 %v2169_v4, %v2173_v45  ;;  %2184 = vpow2.f32 %v697_v8 }
 0x5b8   :  { %1526 = vmax.xlane.f32.xlu2 %v1525_v54  ;;  %884 = vmatpush.bf16.xpose.msrb.mxu1 %v832_v57  ;;  %v627_v54 = vsub.f32 %v3570_v30, %v533_v52  ;;  %v1254_v57 = vpack.c.bf16 %v1238_v15, %v1237_v32  ;;  %v2177_v50 = vpop.eup %2176  ;;  %v1498_v30 = vmax.f32 %v2913_v5, %v2915_v29 }
 0x5ba   :  { %v691_v59 = vmul.f32 1.442695, %v627_v54  ;;  %v2179_v6 = vpop.eup %2178 }
 0x5bb   :  { %v2181_v32 = vpop.eup %2180  ;;  %v827_v15 = vpack.c.bf16 %v2179_v6, %v2175_v7 }
 0x5bc   :  { %v3030_v40 = vpop.f32.mrf.mxu2  ;;  %2186 = vpow2.f32 %v691_v59  ;;  %v828_v36 = vpack.c.bf16 %v2181_v32, %v2177_v50  ;;  %v2183_v3 = vpop.eup %2182 }
 0x5bd   :  { %v3032_v20 = vpop.f32.mrf.mxu3  ;;  %2188 = vpow2.f32 %v693_v0  ;;  %v2185_v45 = vpop.eup %2184 }
 0x5be   :  { %v1528_v63 = vmax.f32 %v3030_v40, %v3032_v20 }
 0x5bf   :  { %862 = vmatpush.bf16.xpose.msrb.mxu0 %v829_v56 }
 0x5c0   :  { %1493 = vmax.xlane.f32.xlu2 %v1492_v44  ;;  %1529 = vmax.xlane.f32.xlu1 %v1528_v63 }
 0x5c1   :  { %885 = vmatpush.bf16.xpose.msrb.mxu1 %v830_v62  ;;  %2032 = vmatmul.msk.bf16.gmra.mxu2 %vm297_vm2, %v1254_v57 }
 0x5c2   :  { %2048 = vmatmul.msk.bf16.gmra.mxu3 %vm297_vm2, %v1254_v57  ;;  %v2187_v16 = vpop.eup %2186  ;;  %v1489_v57 = vmax.f32 %v2897_v58, %v2899_v23 }
 0x5c3   :  { %v2189_v63 = vpop.eup %2188  ;;  %v825_v56 = vpack.c.bf16 %v2183_v3, %v2187_v16 }
 0x5c4   :  { %v3044_v4 = vpop.f32.mrf.mxu2  ;;  %v826_v62 = vpack.c.bf16 %v2185_v45, %v2189_v63 }
 0x5c5   :  { %v3046_v60 = vpop.f32.mrf.mxu3 }
 0x5c6   :  { %v1531_v52 = vmax.f32 %v3044_v4, %v3046_v60 }
 0x5c7   :  { %863 = vmatpush.bf16.xpose.msrb.mxu0 %v827_v15 }
 0x5c8   :  { %1532 = vmax.xlane.f32.xlu0 %v1531_v52 }
 0x5c9   :  { %886 = vmatpush.bf16.xpose.msrb.mxu1 %v828_v36 }
 0x5cc   :  { %v3050_v10 = vpop.f32.mrf.mxu2 }
 0x5cd   :  { %v3052_v44 = vpop.f32.mrf.mxu3 }
 0x5ce   :  { %v1534_v54 = vmax.f32 %v3050_v10, %v3052_v44 }
 0x5cf   :  { %864 = vmatpush.bf16.xpose.msrb.mxu0 %v825_v56 }
 0x5d0   :  { %1499 = vmax.xlane.f32.xlu0 %v1498_v30  ;;  %1535 = vmax.xlane.f32.xlu2 %v1534_v54 }
 0x5d1   :  { %887 = vmatpush.bf16.xpose.msrb.mxu1 %v826_v62 }
 0x5d4   :  { %v3058_v43 = vpop.f32.mrf.mxu2 }
 0x5d5   :  { %v3060_v55 = vpop.f32.mrf.mxu3 }
 0x5d6   :  { %865 = vmatmul.bf16.vlgmr.msrb.gmra.mxu0 %v2765_v38 }
 0x5d8   :  { %888 = vmatmul.bf16.vlgmr.msrb.gmra.mxu1 %v2767_v35  ;;  %1490 = vmax.xlane.f32.xlu0 %v1489_v57 }
 0x5d9   :  { %1073 = vperm.xlu1 %2061, %v2326_v11  }
 0x5dc   :  { %v3069_v8 = vpop.f32.mrf.mxu2 }
 0x5dd   :  { %3572 = vst [vmem:[#allocation21_spill] sm:$0xff] %v3069_v8  ;;  %v3071_v7 = vpop.f32.mrf.mxu3 }
 0x5e4   :  { %v3073_v59 = vpop.f32.mrf.mxu2 }
 0x5e5   :  { %3573 = vst [vmem:[#allocation22_spill] sm:$0xff] %v3073_v59  ;;  %v3075_v50 = vpop.f32.mrf.mxu3 }
 0x5e6   :  { %3574 = vst [vmem:[#allocation23_spill] sm:$0xff] %v3075_v50  ;;  %870 = vmatmul.bf16.gmra.mxu0 %v2786_v1 }
 0x5e8   :  { %893 = vmatmul.bf16.gmra.mxu1 %v2788_v12 }
 0x5ea   :  { %v1503_v38 = vpop.xlane.xlu0 %1502 }
 0x5eb   :  { %v1593_v6 = vsub.f32 %v2921_v14, %v1503_v38  ;;  %v1594_v32 = vsub.f32 %v2923_v17, %v1503_v38 }
 0x5ec   :  { %v3079_v35 = vpop.f32.mrf.mxu2 }
 0x5ed   :  { %v3081_v0 = vpop.f32.mrf.mxu3  ;;  %v1665_v52 = vmul.f32 1.442695, %v1593_v6  ;;  %v1667_v15 = vmul.f32 1.442695, %v1594_v32 }
 0x5ef   :  { %2190 = vpow2.f32 %v1665_v52 }
 0x5f0   :  { %2192 = vpow2.f32 %v1667_v15 }
 0x5f2   :  { %v1506_v36 = vpop.xlane.xlu2 %1505 }
 0x5f3   :  { %v1595_v3 = vsub.f32 %v2927_v25, %v1506_v36  ;;  %v1596_v45 = vsub.f32 %v2929_v49, %v1506_v36 }
 0x5f4   :  { %v3087_v16 = vpop.f32.mrf.mxu2 }
 0x5f5   :  { %v3089_v1 = vpop.f32.mrf.mxu3  ;;  %v1669_v12 = vmul.f32 1.442695, %v1595_v3  ;;  %v1671_v63 = vmul.f32 1.442695, %v1596_v45  ;;  %v3093_v14 = vpop.eup %2190 }
 0x5f6   :  { %875 = vmatmul.bf16.gmra.mxu0 %v2792_v42  ;;  %v3095_v17 = vpop.eup %2192 }
 0x5f7   :  { %2194 = vpow2.f32 %v1669_v12 }
 0x5f8   :  { %898 = vmatmul.bf16.gmra.mxu1 %v2794_v47  ;;  %2196 = vpow2.f32 %v1671_v63 }
 0x5fa   :  { %v3129_v3 = vpop.xlane.xlu2 %1508 }
 0x5fc   :  { %v3097_v25 = vpop.f32.mrf.mxu2 }
 0x5fd   :  { %3575 = vst [vmem:[#allocation19_spill] sm:$0xff] %v3097_v25  ;;  %v3099_v49 = vpop.f32.mrf.mxu3  ;;  %v3101_v30 = vpop.eup %2194 }
 0x5fe   :  { %3576 = vst [vmem:[#allocation20_spill] sm:$0xff] %v3099_v49  ;;  %v3103_v54 = vpop.eup %2196  ;;  %v1552_v46 = vmax.f32 %v3097_v25, %v3099_v49 }
 0x604   :  { %v3109_v47 = vpop.f32.mrf.mxu2 }
 0x605   :  { %3577 = vst [vmem:[#allocation17_spill] sm:$0xff] %v3109_v47  ;;  %v3111_v62 = vpop.f32.mrf.mxu3 }
 0x606   :  { %3578 = vst [vmem:[#allocation18_spill] sm:$0xff] %v3111_v62 }
 0x60c   :  { %v3113_v57 = vpop.f32.mrf.mxu2 }
 0x60d   :  { %3579 = vst [vmem:[#allocation15_spill] sm:$0xff] %v3113_v57  ;;  %v3115_v11 = vpop.f32.mrf.mxu3 }
 0x60e   :  { %3580 = vst [vmem:[#allocation16_spill] sm:$0xff] %v3115_v11  ;;  %v1558_v9 = vmax.f32 %v3113_v57, %v3115_v11 }
 0x613   :  { %v3141_v56 = vpop.xlane.xlu0 %1517 }
 0x614   :  { %v3117_v38 = vpop.f32.mrf.mxu2 }
 0x615   :  { %3581 = vst [vmem:[#allocation13_spill] sm:$0xff] %v3117_v38  ;;  %v3119_v6 = vpop.f32.mrf.mxu3 }
 0x616   :  { %3582 = vst [vmem:[#allocation14_spill] sm:$0xff] %v3119_v6  ;;  %v1561_v32 = vmax.f32 %v3117_v38, %v3119_v6 }
 0x618   :  { %1562 = vmax.xlane.f32.xlu0 %v1561_v32  ;;  %v3139_v32 = vpop.xlane.xlu1 %1496 }
 0x61c   :  { %v3123_v52 = vpop.f32.mrf.mxu2 }
 0x61d   :  { %3583 = vst [vmem:[#allocation11_spill] sm:$0xff] %v3123_v52  ;;  %v3125_v15 = vpop.f32.mrf.mxu3 }
 0x61e   :  { %3584 = vst [vmem:[#allocation12_spill] sm:$0xff] %v3125_v15  ;;  %v1564_v36 = vmax.f32 %v3123_v52, %v3125_v15 }
 0x620   :  { %1565 = vmax.xlane.f32.xlu2 %v1564_v36  ;;  %v1555_v36 = vmax.f32 %v3109_v47, %v3111_v62 }
 0x623   :  { %v3137_v42 = vpop.xlane.xlu2 %1523 }
 0x624   :  { %v3131_v45 = vpop.f32.mrf.mxu2 }
 0x625   :  { %3585 = vst [vmem:[#allocation10_spill] sm:$0xff] %v3131_v45  ;;  %v3133_v12 = vpop.f32.mrf.mxu3 }
 0x626   :  { %3586 = vst [vmem:[#allocation8_spill] sm:$0xff] %v3133_v12  ;;  %v1567_v63 = vmax.f32 %v3131_v45, %v3133_v12  ;;  %v3151_v12 = vpop.xlane.xlu1 %1511 }
 0x628   :  { %1568 = vmax.xlane.f32.xlu2 %v1567_v63  ;;  %v3153_v63 = vpop.xlane.xlu0 %1520 }
 0x62b   :  { %v1527_v52 = vpop.xlane.xlu2 %1526 }
 0x62c   :  { %v3143_v6 = vpop.f32.mrf.mxu2 }
 0x62d   :  { %3587 = vst [vmem:[#allocation9_spill] sm:$0xff] %v3143_v6  ;;  %v3145_v15 = vpop.f32.mrf.mxu3 }
 0x62e   :  { %3588 = vst [vmem:[#allocation6_spill] sm:$0xff] %v3145_v15  ;;  %v1570_v38 = vmax.f32 %v3143_v6, %v3145_v15 }
 0x630   :  { %1556 = vmax.xlane.f32.xlu2 %v1555_v36  ;;  %1571 = vmax.xlane.f32.xlu1 %v1570_v38  ;;  %v3165_v38 = vpop.xlane.xlu1 %1514 }
 0x633   :  { %v3163_v47 = vpop.xlane.xlu2 %1493 }
 0x634   :  { %v3155_v45 = vpop.f32.mrf.mxu2 }
 0x635   :  { %3589 = vst [vmem:[#allocation7_spill] sm:$0xff] %v3155_v45  ;;  %v3157_v22 = vpop.f32.mrf.mxu3 }
 0x636   :  { %3590 = vst [vmem:[#allocation5_spill] sm:$0xff] %v3157_v22  ;;  %v1573_v62 = vmax.f32 %v3155_v45, %v3157_v22 }
 0x638   :  { %1559 = vmax.xlane.f32.xlu2 %v1558_v9  ;;  %1574 = vmax.xlane.f32.xlu1 %v1573_v62  ;;  %v1530_v22 = vpop.xlane.xlu1 %1529 }
 0x63b   :  { %v1533_v36 = vpop.xlane.xlu0 %1532 }
 0x63c   :  { %v3167_v15 = vpop.f32.mrf.mxu2  ;;  %v1613_v57 = vsub.f32 %v3044_v4, %v1533_v36  ;;  %v1614_v9 = vsub.f32 %v3046_v60, %v1533_v36  ;;  %v1612_v60 = vsub.f32 %v3032_v20, %v1530_v22 }
 0x63d   :  { %v3169_v6 = vpop.f32.mrf.mxu3 }
 0x63e   :  { %v1576_v11 = vmax.f32 %v3167_v15, %v3169_v6  ;;  %v1705_v45 = vmul.f32 1.442695, %v1613_v57  ;;  %v1707_v50 = vmul.f32 1.442695, %v1614_v9  ;;  %v1703_v36 = vmul.f32 1.442695, %v1612_v60 }
 0x640   :  { %1553 = vmax.xlane.f32.xlu2 %v1552_v46  ;;  %1577 = vmax.xlane.f32.xlu0 %v1576_v11  ;;  %v1611_v11 = vsub.f32 %v3030_v40, %v1530_v22  ;;  %2198 = vpow2.f32 %v1705_v45 }
 0x641   :  { %2200 = vpow2.f32 %v1707_v50  ;;  %v1608_v50 = vsub.f32 %v3008_v31, %v3137_v42 }
 0x642   :  { %v1701_v57 = vmul.f32 1.442695, %v1611_v11 }
 0x643   :  { %v1536_v62 = vpop.xlane.xlu2 %1535  ;;  %v1695_v31 = vmul.f32 1.442695, %v1608_v50 }
 0x644   :  { %v1615_v41 = vsub.f32 %v3050_v10, %v1536_v62  ;;  %v1616_v59 = vsub.f32 %v3052_v44, %v1536_v62  ;;  %v3179_v8 = vpop.f32.mrf.mxu2  ;;  %v1609_v10 = vsub.f32 %v3019_v53, %v1527_v52  ;;  %v1610_v44 = vsub.f32 %v3021_v18, %v1527_v52  ;;  %v1067_v52 = vld [vmem:[%s3467_s4 + $0x8] sm:$0xff] }
 0x645   :  { %v3181_v49 = vpop.f32.mrf.mxu3  ;;  %v1607_v53 = vsub.f32 %v3006_v39, %v3137_v42  ;;  %v1606_v39 = vsub.f32 %v2997_v28, %v3153_v63 }
 0x646   :  { %v1709_v25 = vmul.f32 1.442695, %v1615_v41  ;;  %v1579_v4 = vmax.f32 %v3179_v8, %v3181_v49  ;;  %v1711_v46 = vmul.f32 1.442695, %v1616_v59  ;;  %v2199_v59 = vpop.eup %2198  ;;  %v1697_v62 = vmul.f32 1.442695, %v1609_v10 }
 0x647   :  { %v2201_v45 = vpop.eup %2200  ;;  %v1699_v22 = vmul.f32 1.442695, %v1610_v44  ;;  %v1693_v11 = vmul.f32 1.442695, %v1607_v53 }
 0x648   :  { %1580 = vmax.xlane.f32.xlu2 %v1579_v4  ;;  %2202 = vpow2.f32 %v1709_v25  ;;  %v1605_v4 = vsub.f32 %v2995_v2, %v3153_v63  ;;  %v1604_v63 = vsub.f32 %v2982_v21, %v3141_v56  ;;  %v1069_v21 = vld [vmem:[%s3467_s4 + $0x18] sm:$0xff] }
 0x649   :  { %2204 = vpow2.f32 %v1711_v46 }
 0x64a   :  { %2206 = vpow2.f32 %v1701_v57  ;;  %v1689_v44 = vmul.f32 1.442695, %v1605_v4 }
 0x64b   :  { %2208 = vpow2.f32 %v1703_v36 }
 0x64c   :  { %v3189_v41 = vpop.f32.mrf.mxu2  ;;  %2210 = vpow2.f32 %v1697_v62  ;;  %v1603_v62 = vsub.f32 %v2980_v37, %v3141_v56  ;;  %v1687_v37 = vmul.f32 1.442695, %v1604_v63  ;;  %v1500_v63 = vpop.xlane.xlu0 %1499 }
 0x64d   :  { %v3191_v9 = vpop.f32.mrf.mxu3  ;;  %2212 = vpow2.f32 %v1699_v22 }
 0x64e   :  { %v1582_v40 = vmax.f32 %v3189_v41, %v3191_v9  ;;  %v2203_v20 = vpop.eup %2202  ;;  %2214 = vpow2.f32 %v1693_v11  ;;  %v1685_v53 = vmul.f32 1.442695, %v1603_v62 }
 0x64f   :  { %v2205_v18 = vpop.eup %2204  ;;  %v1797_v25 = vpack.c.bf16 %v2203_v20, %v2199_v59  ;;  %v1691_v59 = vmul.f32 1.442695, %v1606_v39  ;;  %2216 = vpow2.f32 %v1695_v31  ;;  %v1602_v20 = vsub.f32 %v2969_v61, %v3165_v38 }
 0x650   :  { %1583 = vmax.xlane.f32.xlu1 %v1582_v40  ;;  %v1798_v46 = vpack.c.bf16 %v2205_v18, %v2201_v45  ;;  %v2207_v10 = vpop.eup %2206  ;;  %v1601_v45 = vsub.f32 %v2967_v27, %v3165_v38  ;;  %2218 = vpow2.f32 %v1689_v44  ;;  %v1599_v61 = vsub.f32 %v2953_v51, %v3151_v12 }
 0x651   :  { %1815 = vmatpush.bf16.xpose.msra.mxu0 %v1797_v25  ;;  %v2209_v36 = vpop.eup %2208  ;;  %2220 = vpow2.f32 %v1691_v59  ;;  %v1683_v4 = vmul.f32 1.442695, %v1602_v20  ;;  %v1600_v39 = vsub.f32 %v2955_v34, %v3151_v12  ;;  %v1597_v31 = vsub.f32 %v2938_v24, %v3129_v3  ;;  %v1068_v24 = vld [vmem:[%s3467_s4 + $0x10] sm:$0xff] }
 0x652   :  { %1838 = vmatpush.bf16.xpose.msra.mxu1 %v1798_v46  ;;  %v2211_v2 = vpop.eup %2210  ;;  %v1681_v25 = vmul.f32 1.442695, %v1601_v45  ;;  %2222 = vpow2.f32 %v1685_v53 }
 0x653   :  { %v866_v42 = vpop.f32.mrf.mxu0  ;;  %v2213_v28 = vpop.eup %2212  ;;  %v1795_v40 = vpack.c.bf16 %v2207_v10, %v2211_v2  ;;  %2224 = vpow2.f32 %v1687_v37  ;;  %v1677_v10 = vmul.f32 1.442695, %v1599_v61  ;;  %v1679_v51 = vmul.f32 1.442695, %v1600_v39 }
 0x654   :  { %1078 = vperm.xlu0 %2059, %v1067_v52   ;;  %v1796_v22 = vpack.c.bf16 %v2209_v36, %v2213_v28  ;;  %v2215_v56 = vpop.eup %2214  ;;  %2226 = vpow2.f32 %v1681_v25  ;;  %v1673_v2 = vmul.f32 1.442695, %v1597_v31 }
 0x655   :  { %v889_v60 = vpop.f32.mrf.mxu1  ;;  %v2217_v27 = vpop.eup %2216  ;;  %2228 = vpow2.f32 %v1683_v4 }
 0x656   :  { %v3206_v57 = vadd.f32 %v889_v60, %v866_v42  ;;  %v2219_v46 = vpop.eup %2218  ;;  %v1598_v60 = vsub.f32 %v2940_v13, %v3129_v3  ;;  %2230 = vpow2.f32 %v1677_v10  ;;  %v3591_v10 = vpack.c.bf16 %v3101_v30, %v3093_v14 }
 0x657   :  { %v2221_v38 = vpop.eup %2220  ;;  %v1793_v11 = vpack.c.bf16 %v2215_v56, %v2219_v46  ;;  %2232 = vpow2.f32 %v1679_v51  ;;  %v1592_v56 = vsub.f32 %v2915_v29, %v1500_v63  ;;  %v1590_v46 = vsub.f32 %v2909_v48, %v3139_v32 }
 0x658   :  { %v1794_v42 = vpack.c.bf16 %v2217_v27, %v2221_v38  ;;  %v2223_v59 = vpop.eup %2222  ;;  %v1675_v62 = vmul.f32 1.442695, %v1598_v60  ;;  %2234 = vpow2.f32 %v1673_v2  ;;  %v1589_v27 = vsub.f32 %v2907_v33, %v3139_v32  ;;  %v1491_v38 = vpop.xlane.xlu0 %1490 }
 0x659   :  { %1816 = vmatpush.bf16.xpose.msra.mxu0 %v1795_v40  ;;  %v2225_v12 = vpop.eup %2224  ;;  %v1663_v39 = vmul.f32 1.442695, %v1592_v56  ;;  %v1659_v60 = vmul.f32 1.442695, %v1590_v46  ;;  %v1585_v29 = vsub.f32 %v2897_v58, %v1491_v38  ;;  %v1586_v33 = vsub.f32 %v2899_v23, %v1491_v38  ;;  %v1074_v46 = vpop.permute.xlu1 %1073 }
 0x65a   :  { %1839 = vmatpush.bf16.xpose.msra.mxu1 %v1796_v22  ;;  %v2227_v28 = vpop.eup %2226  ;;  %2236 = vpow2.f32 %v1675_v62  ;;  %v1587_v48 = vsub.f32 %v2901_v19, %v3163_v47  ;;  %v1588_v32 = vsub.f32 %v2903_v26, %v3163_v47  ;;  %v11_v51 = vstv %s3468_s5 }
 0x65b   :  { %v868_v18 = vpop.f32.mrf.mxu0  ;;  %v2229_v13 = vpop.eup %2228  ;;  %v1791_v3 = vpack.c.bf16 %v2223_v59, %v2227_v28  ;;  %v1649_v58 = vmul.f32 1.442695, %v1585_v29  ;;  %v3592_v23 = vpack.c.bf16 %v3103_v54, %v3095_v17  ;;  %v1549_v19 = vmax.f32 %v3087_v16, %v3089_v1  ;;  %12 = vst [vmem:[#allocation2] sm:$0x1] %v11_v51 }
 0x65c   :  { %v1792_v40 = vpack.c.bf16 %v2225_v12, %v2229_v13  ;;  %v2231_v20 = vpop.eup %2230  ;;  %v1653_v59 = vmul.f32 1.442695, %v1587_v48  ;;  %v1655_v30 = vmul.f32 1.442695, %v1588_v32  ;;  %v1537_v54 = vmax.f32 %v3058_v43, %v3060_v55 }
 0x65d   :  { %v891_v50 = vpop.f32.mrf.mxu1  ;;  %v2233_v37 = vpop.eup %2232  ;;  %v1546_v13 = vmax.f32 %v3079_v35, %v3081_v0 }
 0x65e   :  { %v3219_v52 = vadd.f32 %v891_v50, %v868_v18  ;;  %v2235_v18 = vpop.eup %2234  ;;  %v1591_v50 = vsub.f32 %v2913_v5, %v1500_v63 }
 0x65f   :  { %v1789_v25 = vpack.c.bf16 %v2231_v20, %v2235_v18  ;;  %v3595_v18 = vld [vmem:[#allocation22_spill] sm:$0xff] }
 0x660   :  { %1088 = vperm.xlu2 %2060, %v1069_v21   ;;  %v2237_v21 = vpop.eup %2236  ;;  %v1661_v61 = vmul.f32 1.442695, %v1591_v50 }
 0x661   :  { %1817 = vmatpush.bf16.xpose.msra.mxu0 %v1793_v11  ;;  %v1790_v4 = vpack.c.bf16 %v2233_v37, %v2237_v21  ;;  %v3594_v37 = vld [vmem:[#allocation23_spill] sm:$0xff] }
 0x662   :  { %1840 = vmatpush.bf16.xpose.msra.mxu1 %v1794_v42  ;;  %v1657_v42 = vmul.f32 1.442695, %v1589_v27  ;;  %2238 = vpow2.f32 %v1661_v61  ;;  %v1543_v50 = vmax.f32 %v3595_v18, %v3594_v37  ;;  %v949_v27 = vld [vmem:[#allocation2] sm:$0x1] }
 0x663   :  { %v871_v44 = vpop.f32.mrf.mxu0  ;;  %2240 = vpow2.f32 %v1663_v39  ;;  %v1070_v61 = vld [vmem:[%s3467_s4 + $0x20] sm:$0x1] }
 0x664   :  { %2242 = vpow2.f32 %v1657_v42 }
 0x665   :  { %v894_v36 = vpop.f32.mrf.mxu1  ;;  %2244 = vpow2.f32 %v1659_v60 }
 0x666   :  { %v3229_v34 = vadd.f32 %v894_v36, %v871_v44  ;;  %v1651_v44 = vmul.f32 1.442695, %v1586_v33  ;;  %2246 = vpow2.f32 %v1649_v58 }
 0x668   :  { %v2239_v47 = vpop.eup %2238  ;;  %2248 = vpow2.f32 %v1651_v44 }
 0x669   :  { %1083 = vperm.xlu1 %2061, %v1068_v24   ;;  %1818 = vmatpush.bf16.xpose.msra.mxu0 %v1791_v3  ;;  %v2241_v14 = vpop.eup %2240  ;;  %2250 = vpow2.f32 %v1653_v59 }
 0x66a   :  { %1841 = vmatpush.bf16.xpose.msra.mxu1 %v1792_v40  ;;  %v2243_v2 = vpop.eup %2242  ;;  %2252 = vpow2.f32 %v1655_v30 }
 0x66b   :  { %v873_v45 = vpop.f32.mrf.mxu0  ;;  %v2245_v24 = vpop.eup %2244  ;;  %v1785_v12 = vpack.c.bf16 %v2239_v47, %v2243_v2 }
 0x66c   :  { %v1786_v17 = vpack.c.bf16 %v2241_v14, %v2245_v24  ;;  %v2247_v62 = vpop.eup %2246  ;;  %v3599_v24 = vld [vmem:[#allocation35_spill] sm:$0xff] }
 0x66d   :  { %v896_v22 = vpop.f32.mrf.mxu1 }
 0x66e   :  { %v3234_v53 = vadd.f32 %v896_v22, %v873_v45  ;;  %v2249_v28 = vpop.eup %2248  ;;  %v3593_v22 = vld [vmem:[#allocation21_spill] sm:$0xff] }
 0x66f   :  { %v2251_v3 = vpop.eup %2250  ;;  %v1540_v20 = vmax.f32 %v3593_v22, %v3071_v7 }
 0x670   :  { %v2253_v63 = vpop.eup %2252  ;;  %v1783_v40 = vpack.c.bf16 %v2251_v3, %v2247_v62 }
 0x671   :  { %1819 = vmatpush.bf16.xpose.msra.mxu0 %v1789_v25  ;;  %v1784_v45 = vpack.c.bf16 %v2253_v63, %v2249_v28  ;;  %v1907_v25 = vld [vmem:[#allocation2] sm:$0x1] }
 0x672   :  { %1842 = vmatpush.bf16.xpose.msra.mxu1 %v1790_v4 }
 0x673   :  { %v876_v11 = vpop.f32.mrf.mxu0 }
 0x675   :  { %v899_v31 = vpop.f32.mrf.mxu1 }
 0x676   :  { %v3242_v5 = vadd.f32 %v899_v31, %v876_v11 }
 0x679   :  { %1820 = vmatpush.bf16.xpose.msra.mxu0 %v3591_v10 }
 0x67a   :  { %1843 = vmatpush.bf16.xpose.msra.mxu1 %v3592_v23 }
 0x67b   :  { %v878_v36 = vpop.f32.mrf.mxu0 }
 0x67c   :  { %v3597_v36 = vld [vmem:[#allocation33_spill] sm:$0xff] }
 0x67d   :  { %v901_v26 = vpop.f32.mrf.mxu1 }
 0x67e   :  { %1550 = vmax.xlane.f32.xlu0 %v1549_v19  ;;  %v3596_v19 = vld [vmem:[#allocation32_spill] sm:$0xff]  ;;  %v1161_v26 = vadd.f32 %v3597_v36, %v1074_v46 }
 0x67f   :  { %v1129_v44 = vadd.f32 %v3596_v19, %v1074_v46 }
 0x681   :  { %1821 = vmatpush.bf16.xpose.msra.mxu0 %v1785_v12 }
 0x682   :  { %1844 = vmatpush.bf16.xpose.msra.mxu1 %v1786_v17 }
 0x686   :  { %1538 = vmax.xlane.f32.xlu0 %v1537_v54 }
 0x689   :  { %1547 = vmax.xlane.f32.xlu2 %v1546_v13  ;;  %1822 = vmatpush.bf16.xpose.msra.mxu0 %v1783_v40 }
 0x68a   :  { %1845 = vmatpush.bf16.xpose.msra.mxu1 %v1784_v45 }
 0x68b   :  { %v3282_v31 = vpop.xlane.xlu0 %1562 }
 0x68e   :  { %1541 = vmax.xlane.f32.xlu0 %v1540_v20  ;;  %v3602_v20 = vld [vmem:[#allocation9_spill] sm:$0xff] }
 0x693   :  { %1544 = vmax.xlane.f32.xlu1 %v1543_v50  ;;  %v3269_v21 = vpop.xlane.xlu2 %1565 }
 0x69b   :  { %v3271_v56 = vpop.xlane.xlu2 %1568 }
 0x6a1   :  { %1912 = vperm.xlu2 %2060, %v1907_v25  }
 0x6a2   :  { %954 = vperm.xlu0 %2059, %v949_v27   ;;  %v3603_v27 = vld [vmem:[#allocation6_spill] sm:$0xff] }
 0x6a3   :  { %v3273_v4 = vpop.xlane.xlu2 %1556  ;;  %v1572_v39 = vpop.xlane.xlu1 %1571 }
 0x6a4   :  { %v1639_v50 = vsub.f32 %v3602_v20, %v1572_v39  ;;  %v1640_v46 = vsub.f32 %v3603_v27, %v1572_v39 }
 0x6ab   :  { %v3278_v38 = vpop.xlane.xlu2 %1559  ;;  %v1575_v42 = vpop.xlane.xlu1 %1574 }
 0x6ac   :  { %1093 = vperm.xlu1 %2061, %v1070_v61  }
 0x6b3   :  { %v3280_v11 = vpop.xlane.xlu2 %1553  ;;  %v1578_v29 = vpop.xlane.xlu0 %1577 }
 0x6b4   :  { %v1643_v47 = vsub.f32 %v3167_v15, %v1578_v29 }
 0x6b6   :  { %v1765_v28 = vmul.f32 1.442695, %v1643_v47  ;;  %v3607_v47 = vld [vmem:[#allocation13_spill] sm:$0xff] }
 0x6bb   :  { %v1581_v60 = vpop.xlane.xlu2 %1580 }
 0x6bc   :  { %v1645_v33 = vsub.f32 %v3179_v8, %v1581_v60  ;;  %v1646_v48 = vsub.f32 %v3181_v49, %v1581_v60  ;;  %v1644_v8 = vsub.f32 %v3169_v6, %v1578_v29  ;;  %v3598_v49 = vld [vmem:[#allocation34_spill] sm:$0xff] }
 0x6be   :  { %v1769_v32 = vmul.f32 1.442695, %v1645_v33  ;;  %v1771_v10 = vmul.f32 1.442695, %v1646_v48  ;;  %v1767_v13 = vmul.f32 1.442695, %v1644_v8 }
 0x6bf   :  { %v3605_v33 = vld [vmem:[#allocation8_spill] sm:$0xff] }
 0x6c0   :  { %2254 = vpow2.f32 %v1769_v32  ;;  %v1638_v48 = vsub.f32 %v3605_v33, %v3271_v56  ;;  %v1757_v32 = vmul.f32 1.442695, %v1639_v50 }
 0x6c1   :  { %2256 = vpow2.f32 %v1771_v10  ;;  %v1759_v10 = vmul.f32 1.442695, %v1640_v46 }
 0x6c2   :  { %v1755_v19 = vmul.f32 1.442695, %v1638_v48  ;;  %v3616_v48 = vld [vmem:[#allocation17_spill] sm:$0xff] }
 0x6c3   :  { %v1584_v51 = vpop.xlane.xlu1 %1583 }
 0x6c4   :  { %v1647_v58 = vsub.f32 %v3189_v41, %v1584_v51  ;;  %v1648_v23 = vsub.f32 %v3191_v9, %v1584_v51  ;;  %v3600_v41 = vld [vmem:[#allocation7_spill] sm:$0xff]  ;;  %v3601_v9 = vld [vmem:[#allocation5_spill] sm:$0xff] }
 0x6c5   :  { %v1641_v17 = vsub.f32 %v3600_v41, %v1575_v42  ;;  %v1642_v54 = vsub.f32 %v3601_v9, %v1575_v42  ;;  %v3604_v42 = vld [vmem:[#allocation10_spill] sm:$0xff] }
 0x6c6   :  { %v1773_v59 = vmul.f32 1.442695, %v1647_v58  ;;  %v1775_v14 = vmul.f32 1.442695, %v1648_v23  ;;  %v1079_v30 = vpop.permute.xlu0 %1078  ;;  %v2255_v6 = vpop.eup %2254  ;;  %v1637_v60 = vsub.f32 %v3604_v42, %v3271_v56  ;;  %v3608_v56 = vld [vmem:[#allocation12_spill] sm:$0xff] }
 0x6c7   :  { %v1132_v2 = vadd.f32 %v3598_v49, %v1079_v30  ;;  %v1164_v12 = vadd.f32 %v3599_v24, %v1079_v30  ;;  %v1761_v3 = vmul.f32 1.442695, %v1641_v17  ;;  %v2257_v63 = vpop.eup %2256  ;;  %v1763_v40 = vmul.f32 1.442695, %v1642_v54  ;;  %v3609_v49 = vld [vmem:[#allocation14_spill] sm:$0xff]  ;;  %v1089_v24 = vpop.permute.xlu2 %1088 }
 0x6c8   :  { %2258 = vpow2.f32 %v1773_v59  ;;  %v1753_v58 = vmul.f32 1.442695, %v1637_v60  ;;  %v1633_v59 = vsub.f32 %v3607_v47, %v3282_v31  ;;  %v3615_v60 = vld [vmem:[#allocation16_spill] sm:$0xff] }
 0x6c9   :  { %2260 = vpow2.f32 %v1775_v14  ;;  %v3296_v62 = vpack.c.bf16 %v1132_v2, %v1129_v44  ;;  %v3298_v15 = vpack.c.bf16 %v1164_v12, %v1161_v26  ;;  %v3606_v44 = vld [vmem:[#allocation11_spill] sm:$0xff]  ;;  %v1636_v14 = vsub.f32 %v3608_v56, %v3269_v21 }
 0x6ca   :  { %2262 = vpow2.f32 %v1765_v28  ;;  %v1635_v36 = vsub.f32 %v3606_v44, %v3269_v21  ;;  %v1634_v2 = vsub.f32 %v3609_v49, %v3282_v31  ;;  %v1745_v41 = vmul.f32 1.442695, %v1633_v59  ;;  %v3610_v28 = vld [vmem:[#allocation38_spill] sm:$0xff]  ;;  %v3619_v49 = vld [vmem:[#allocation20_spill] sm:$0xff] }
 0x6cb   :  { %1823 = vmatmul.bf16.vlgmr.msra.gmra.mxu0 %v3296_v62  ;;  %1846 = vmatmul.bf16.vlgmr.msra.gmra.mxu1 %v3298_v15  ;;  %2264 = vpow2.f32 %v1767_v13  ;;  %v1751_v17 = vmul.f32 1.442695, %v1636_v14  ;;  %v1138_v13 = vadd.f32 %v3610_v28, %v1089_v24 }
 0x6cc   :  { %2266 = vpow2.f32 %v1761_v3  ;;  %v1749_v12 = vmul.f32 1.442695, %v1635_v36  ;;  %v3612_v3 = vld [vmem:[#allocation36_spill] sm:$0xff]  ;;  %v1747_v50 = vmul.f32 1.442695, %v1634_v2  ;;  %v1628_v2 = vsub.f32 %v3619_v49, %v3280_v11 }
 0x6cd   :  { %2268 = vpow2.f32 %v1763_v40  ;;  %v3613_v40 = vld [vmem:[#allocation37_spill] sm:$0xff] }
 0x6ce   :  { %v2259_v45 = vpop.eup %2258  ;;  %2270 = vpow2.f32 %v1757_v32  ;;  %v1629_v32 = vsub.f32 %v3616_v48, %v3273_v4 }
 0x6cf   :  { %v2261_v25 = vpop.eup %2260  ;;  %v1813_v61 = vpack.c.bf16 %v2259_v45, %v2255_v6  ;;  %2272 = vpow2.f32 %v1759_v10  ;;  %v3611_v6 = vld [vmem:[#allocation39_spill] sm:$0xff] }
 0x6d0   :  { %v1814_v29 = vpack.c.bf16 %v2261_v25, %v2257_v63  ;;  %v2263_v51 = vpop.eup %2262  ;;  %2274 = vpow2.f32 %v1753_v58  ;;  %v1170_v21 = vadd.f32 %v3611_v6, %v1089_v24  ;;  %v3614_v25 = vld [vmem:[#allocation15_spill] sm:$0xff] }
 0x6d1   :  { %1861 = vmatpush.bf16.xpose.msrb.mxu0 %v1813_v61  ;;  %v2265_v23 = vpop.eup %2264  ;;  %2276 = vpow2.f32 %v1755_v19  ;;  %v1631_v27 = vsub.f32 %v3614_v25, %v3278_v38 }
 0x6d2   :  { %1884 = vmatpush.bf16.xpose.msrb.mxu1 %v1814_v29  ;;  %v2267_v39 = vpop.eup %2266  ;;  %2278 = vpow2.f32 %v1749_v12  ;;  %v1632_v29 = vsub.f32 %v3615_v60, %v3278_v38  ;;  %v1737_v38 = vmul.f32 1.442695, %v1629_v32 }
 0x6d3   :  { %v2269_v26 = vpop.eup %2268  ;;  %v1811_v30 = vpack.c.bf16 %v2263_v51, %v2267_v39  ;;  %2280 = vpow2.f32 %v1751_v17  ;;  %v3617_v51 = vld [vmem:[#allocation18_spill] sm:$0xff] }
 0x6d4   :  { %v1812_v8 = vpack.c.bf16 %v2265_v23, %v2269_v26  ;;  %v2271_v54 = vpop.eup %2270  ;;  %2282 = vpow2.f32 %v1745_v41  ;;  %v1630_v58 = vsub.f32 %v3617_v51, %v3273_v4  ;;  %v1741_v23 = vmul.f32 1.442695, %v1631_v27  ;;  %v3618_v4 = vld [vmem:[#allocation19_spill] sm:$0xff] }
 0x6d5   :  { %v2273_v20 = vpop.eup %2272  ;;  %2284 = vpow2.f32 %v1747_v50  ;;  %v1743_v19 = vmul.f32 1.442695, %v1632_v29 }
 0x6d6   :  { %v2275_v31 = vpop.eup %2274  ;;  %v1739_v36 = vmul.f32 1.442695, %v1630_v58  ;;  %2286 = vpow2.f32 %v1741_v23  ;;  %v3620_v23 = vld [vmem:[#allocation30_spill] sm:$0xff] }
 0x6d7   :  { %v2277_v42 = vpop.eup %2276  ;;  %v1809_v33 = vpack.c.bf16 %v2271_v54, %v2275_v31  ;;  %2288 = vpow2.f32 %v1743_v19  ;;  %v1735_v54 = vmul.f32 1.442695, %v1628_v2  ;;  %v3621_v19 = vld [vmem:[#allocation31_spill] sm:$0xff] }
 0x6d8   :  { %v1810_v10 = vpack.c.bf16 %v2273_v20, %v2277_v42  ;;  %v2279_v39 = vpop.eup %2278  ;;  %2290 = vpow2.f32 %v1737_v38 }
 0x6d9   :  { %1862 = vmatpush.bf16.xpose.msrb.mxu0 %v1811_v30  ;;  %v2281_v44 = vpop.eup %2280  ;;  %2292 = vpow2.f32 %v1739_v36  ;;  %v1627_v30 = vsub.f32 %v3618_v4, %v3280_v11 }
 0x6da   :  { %1885 = vmatpush.bf16.xpose.msrb.mxu1 %v1812_v8  ;;  %v2283_v26 = vpop.eup %2282 }
 0x6db   :  { %v1084_v9 = vpop.permute.xlu1 %1083  ;;  %v2285_v47 = vpop.eup %2284  ;;  %v1807_v59 = vpack.c.bf16 %v2279_v39, %v2283_v26  ;;  %v1733_v17 = vmul.f32 1.442695, %v1627_v30 }
 0x6dc   :  { %v1135_v63 = vadd.f32 %v3612_v3, %v1084_v9  ;;  %v1167_v45 = vadd.f32 %v3613_v40, %v1084_v9  ;;  %v1808_v56 = vpack.c.bf16 %v2281_v44, %v2285_v47  ;;  %v2287_v14 = vpop.eup %2286 }
 0x6dd   :  { %v2289_v8 = vpop.eup %2288  ;;  %2294 = vpow2.f32 %v1733_v17 }
 0x6de   :  { %v3322_v46 = vpack.c.bf16 %v1138_v13, %v1135_v63  ;;  %v3324_v61 = vpack.c.bf16 %v1170_v21, %v1167_v45  ;;  %v2291_v24 = vpop.eup %2290  ;;  %2296 = vpow2.f32 %v1735_v54  ;;  %v3624_v54 = vld [vmem:[#allocation27_spill] sm:$0xff] }
 0x6df   :  { %v2293_v12 = vpop.eup %2292  ;;  %v1805_v41 = vpack.c.bf16 %v2287_v14, %v2291_v24  ;;  %v3622_v24 = vld [vmem:[#allocation24_spill] sm:$0xff] }
 0x6e0   :  { %1828 = vmatmul.bf16.gmra.mxu0 %v3322_v46  ;;  %1851 = vmatmul.bf16.gmra.mxu1 %v3324_v61  ;;  %v1806_v9 = vpack.c.bf16 %v2289_v8, %v2293_v12  ;;  %v3623_v12 = vld [vmem:[#allocation25_spill] sm:$0xff] }
 0x6e1   :  { %1863 = vmatpush.bf16.xpose.msrb.mxu0 %v1809_v33 }
 0x6e2   :  { %1886 = vmatpush.bf16.xpose.msrb.mxu1 %v1810_v10 }
 0x6e3   :  { %v2295_v11 = vpop.eup %2294 }
 0x6e4   :  { %v2297_v63 = vpop.eup %2296 }
 0x6e9   :  { %1864 = vmatpush.bf16.xpose.msrb.mxu0 %v1807_v59 }
 0x6ea   :  { %1887 = vmatpush.bf16.xpose.msrb.mxu1 %v1808_v56 }
 0x6f1   :  { %v1551_v28 = vpop.xlane.xlu0 %1550  ;;  %1865 = vmatpush.bf16.xpose.msrb.mxu0 %v1805_v41  ;;  %v936_v41 = vadd.f32 %v3623_v12, %v3622_v24 }
 0x6f2   :  { %v1625_v13 = vsub.f32 %v3087_v16, %v1551_v28  ;;  %v1626_v6 = vsub.f32 %v3089_v1, %v1551_v28  ;;  %1888 = vmatpush.bf16.xpose.msrb.mxu1 %v1806_v9  ;;  %v3625_v28 = vld [vmem:[#allocation28_spill] sm:$0xff] }
 0x6f4   :  { %v1729_v21 = vmul.f32 1.442695, %v1625_v13  ;;  %v1731_v3 = vmul.f32 1.442695, %v1626_v6  ;;  %v941_v13 = vadd.f32 %v3625_v28, %v3624_v54 }
 0x6f6   :  { %2298 = vpow2.f32 %v1729_v21 }
 0x6f7   :  { %2300 = vpow2.f32 %v1731_v3 }
 0x6f9   :  { %v1539_v40 = vpop.xlane.xlu0 %1538 }
 0x6fa   :  { %v1618_v39 = vsub.f32 %v3060_v55, %v1539_v40 }
 0x6fc   :  { %v2299_v45 = vpop.eup %2298  ;;  %v1548_v31 = vpop.xlane.xlu2 %1547 }
 0x6fd   :  { %v2301_v20 = vpop.eup %2300  ;;  %v1803_v50 = vpack.c.bf16 %v2295_v11, %v2299_v45  ;;  %v1623_v16 = vsub.f32 %v3079_v35, %v1548_v31  ;;  %v1624_v1 = vsub.f32 %v3081_v0, %v1548_v31  ;;  %v946_v35 = vadd.f32 %v3621_v19, %v3620_v23 }
 0x6fe   :  { %v1804_v25 = vpack.c.bf16 %v2297_v63, %v2301_v20  ;;  %v1617_v0 = vsub.f32 %v3058_v43, %v1539_v40  ;;  %v3626_v40 = vld [vmem:[#allocation26_spill] sm:$0xff] }
 0x6ff   :  { %1866 = vmatpush.bf16.xpose.msrb.mxu0 %v1803_v50  ;;  %v1725_v27 = vmul.f32 1.442695, %v1623_v16  ;;  %v1727_v60 = vmul.f32 1.442695, %v1624_v1 }
 0x700   :  { %1889 = vmatpush.bf16.xpose.msrb.mxu1 %v1804_v25  ;;  %v2327_v25 = vld [vmem:[%s3463_s0] sm:$0xff] }
 0x701   :  { %v1542_v42 = vpop.xlane.xlu0 %1541  ;;  %2302 = vpow2.f32 %v1725_v27 }
 0x702   :  { %v1619_v32 = vsub.f32 %v3593_v22, %v1542_v42  ;;  %v1620_v10 = vsub.f32 %v3071_v7, %v1542_v42  ;;  %2304 = vpow2.f32 %v1727_v60  ;;  %v1715_v7 = vmul.f32 1.442695, %v1618_v39 }
 0x704   :  { %v1717_v38 = vmul.f32 1.442695, %v1619_v32  ;;  %v3628_v32 = vld [vmem:[#allocation40_spill] sm:$0xff] }
 0x706   :  { %v1545_v29 = vpop.xlane.xlu1 %1544 }
 0x707   :  { %v1621_v33 = vsub.f32 %v3595_v18, %v1545_v29  ;;  %v1622_v48 = vsub.f32 %v3594_v37, %v1545_v29  ;;  %v1719_v18 = vmul.f32 1.442695, %v1620_v10  ;;  %v1713_v37 = vmul.f32 1.442695, %v1617_v0  ;;  %v2303_v22 = vpop.eup %2302 }
 0x708   :  { %v2305_v44 = vpop.eup %2304 }
 0x709   :  { %v1721_v51 = vmul.f32 1.442695, %v1621_v33  ;;  %v1723_v58 = vmul.f32 1.442695, %v1622_v48  ;;  %v2331_v33 = vld [vmem:[%s3463_s0 + $0x20] sm:$0xff] }
 0x70b   :  { %2306 = vpow2.f32 %v1721_v51  ;;  %v3629_v51 = vld [vmem:[#allocation41_spill] sm:$0xff] }
 0x70c   :  { %2308 = vpow2.f32 %v1723_v58 }
 0x70d   :  { %2310 = vrcp.f32 %v946_v35 }
 0x70e   :  { %2312 = vrcp.f32 %v3242_v5 }
 0x70f   :  { %2314 = vpow2.f32 %v1717_v38 }
 0x710   :  { %2316 = vpow2.f32 %v1719_v18 }
 0x711   :  { %v2307_v36 = vpop.eup %2306  ;;  %2318 = vpow2.f32 %v1713_v37 }
 0x712   :  { %v2309_v26 = vpop.eup %2308  ;;  %v1801_v43 = vpack.c.bf16 %v2303_v22, %v2307_v36  ;;  %2320 = vpow2.f32 %v1715_v7 }
 0x713   :  { %v1802_v47 = vpack.c.bf16 %v2305_v44, %v2309_v26  ;;  %v2311_v55 = vpop.eup %2310 }
 0x714   :  { %v955_v59 = vpop.permute.xlu0 %954  ;;  %1867 = vmatpush.bf16.xpose.msrb.mxu0 %v1801_v43  ;;  %v2313_v56 = vpop.eup %2312 }
 0x715   :  { %v957_v14 = vperm.slane %v955_v59, 0  ;;  %1890 = vmatpush.bf16.xpose.msrb.mxu1 %v1802_v47  ;;  %v2315_v4 = vpop.eup %2314 }
 0x716   :  { %v2317_v30 = vpop.eup %2316 }
 0x717   :  { %v958_v8 = vmul.f32 %v2313_v56, %v957_v14  ;;  %v959_v5 = vmul.f32 %v2311_v55, %v957_v14  ;;  %v2319_v49 = vpop.eup %2318 }
 0x718   :  { %v2321_v2 = vpop.eup %2320  ;;  %v1799_v6 = vpack.c.bf16 %v2315_v4, %v2319_v49 }
 0x719   :  { %v960_v17 = vperm.slane %v958_v8, 0  ;;  %v961_v9 = vperm.slane %v959_v5, 0  ;;  %v1800_v21 = vpack.c.bf16 %v2317_v30, %v2321_v2 }
 0x71b   :  { %v962_v3 = vmul.f32 %v960_v17, %v3206_v57  ;;  %v963_v11 = vmul.f32 %v961_v9, %v936_v41  ;;  %v964_v63 = vmul.f32 %v960_v17, %v3219_v52  ;;  %v965_v45 = vmul.f32 %v961_v9, %v3626_v40  ;;  %v2328_v57 = vld [vmem:[%s3463_s0 + $0x8] sm:$0xff]  ;;  %v2329_v52 = vld [vmem:[%s3463_s0 + $0x10] sm:$0xff] }
 0x71c   :  { %v966_v20 = vmul.f32 %v960_v17, %v3229_v34  ;;  %v967_v50 = vmul.f32 %v961_v9, %v941_v13  ;;  %v968_v31 = vmul.f32 %v960_v17, %v3234_v53  ;;  %1868 = vmatpush.bf16.xpose.msrb.mxu0 %v1799_v6  ;;  %v3627_v34 = vld [vmem:[#allocation29_spill] sm:$0xff] }
 0x71d   :  { %v970_v16 = vadd.f32 %v2327_v25, %v962_v3  ;;  %v971_v1 = vadd.f32 %v2328_v57, %v963_v11  ;;  %v972_v27 = vadd.f32 %v2329_v52, %v964_v63  ;;  %1891 = vmatpush.bf16.xpose.msrb.mxu1 %v1800_v21  ;;  %v969_v42 = vmul.f32 %v961_v9, %v3627_v34  ;;  %v2330_v53 = vld [vmem:[%s3463_s0 + $0x18] sm:$0xff] }
 0x71e   :  { %v973_v60 = vadd.f32 %v2330_v53, %v965_v45  ;;  %v1094_v29 = vpop.permute.xlu1 %1093  ;;  %v974_v48 = vadd.f32 %v2331_v33, %v966_v20 }
 0x71f   :  { %978 = vst [vmem:[%s3469_s6] sm:$0xff] %v970_v16  ;;  %v1141_v10 = vadd.f32 %v3628_v32, %v1094_v29  ;;  %v1173_v58 = vadd.f32 %v3629_v51, %v1094_v29 }
 0x721   :  { %v1781_v39 = vpack.c.bf16 %v1141_v10, %v1141_v10  ;;  %v1782_v38 = vpack.c.bf16 %v1173_v58, %v1173_v58 }
 0x723   :  { %1833 = vmatmul.bf16.gmra.mxu0 %v1781_v39  ;;  %1856 = vmatmul.bf16.gmra.mxu1 %v1782_v38 }
 0x726   :  { %v2332_v23 = vld [vmem:[%s3463_s0 + $0x28] sm:$0xff] }
 0x727   :  { %v975_v19 = vadd.f32 %v2332_v23, %v967_v50  ;;  %979 = vst [vmem:[%s3469_s6 + $0x8] sm:$0xff] %v971_v1 }
 0x72e   :  { %v2333_v35 = vld [vmem:[%s3463_s0 + $0x30] sm:$0xff] }
 0x72f   :  { %v976_v0 = vadd.f32 %v2333_v35, %v968_v31  ;;  %980 = vst [vmem:[%s3469_s6 + $0x10] sm:$0xff] %v972_v27 }
 0x733   :  { %1869 = vmatmul.bf16.vlgmr.msrb.gmra.mxu0 %v3296_v62  ;;  %1892 = vmatmul.bf16.vlgmr.msrb.gmra.mxu1 %v3298_v15  ;;  %v1913_v62 = vpop.permute.xlu2 %1912 }
 0x734   :  { %v1915_v15 = vperm.slane %v1913_v62, 0 }
 0x736   :  { %v2334_v18 = vld [vmem:[%s3463_s0 + $0x38] sm:$0xff] }
 0x737   :  { %v977_v37 = vadd.f32 %v2334_v18, %v969_v42  ;;  %981 = vst [vmem:[%s3469_s6 + $0x18] sm:$0xff] %v973_v60 }
 0x738   :  { %982 = vst [vmem:[%s3469_s6 + $0x20] sm:$0xff] %v974_v48 }
 0x739   :  { %983 = vst [vmem:[%s3469_s6 + $0x28] sm:$0xff] %v975_v19 }
 0x73a   :  { %984 = vst [vmem:[%s3469_s6 + $0x30] sm:$0xff] %v976_v0 }
 0x73b   :  { %985 = vst [vmem:[%s3469_s6 + $0x38] sm:$0xff] %v977_v37 }
 0x742   :  { %v2335_v54 = vld [vmem:[%s3463_s0 + $0x40] sm:$0xff]  ;;  %v2336_v13 = vld [vmem:[%s3463_s0 + $0x50] sm:$0xff] }
 0x743   :  { %1874 = vmatmul.bf16.gmra.mxu0 %v3322_v46  ;;  %1897 = vmatmul.bf16.gmra.mxu1 %v3324_v61  ;;  %v2337_v21 = vld [vmem:[%s3463_s0 + $0x60] sm:$0xff]  ;;  %v2338_v40 = vld [vmem:[%s3463_s0 + $0x70] sm:$0xff] }
 0x748   :  { %v1824_v22 = vpop.f32.mrf.mxu0  ;;  %v1847_v7 = vpop.f32.mrf.mxu1 }
 0x749   :  { %v1848_v8 = vadd.f32 %v1847_v7, %v1824_v22 }
 0x750   :  { %v1826_v44 = vpop.f32.mrf.mxu0  ;;  %v1849_v36 = vpop.f32.mrf.mxu1 }
 0x751   :  { %v1850_v5 = vadd.f32 %v1849_v36, %v1826_v44 }
 0x753   :  { %1879 = vmatmul.bf16.gmra.mxu0 %v1781_v39  ;;  %1902 = vmatmul.bf16.gmra.mxu1 %v1782_v38 }
 0x75d   :  { %v1829_v26 = vpop.f32.mrf.mxu0  ;;  %v1852_v43 = vpop.f32.mrf.mxu1 }
 0x75e   :  { %v1853_v49 = vadd.f32 %v1852_v43, %v1829_v26 }
 0x765   :  { %v1831_v47 = vpop.f32.mrf.mxu0  ;;  %v1854_v55 = vpop.f32.mrf.mxu1 }
 0x766   :  { %v1855_v2 = vadd.f32 %v1854_v55, %v1831_v47 }
 0x7a0   :  { %v1834_v59 = vpop.f32.mrf.mxu0  ;;  %v1857_v56 = vpop.f32.mrf.mxu1 }
 0x7a1   :  { %v1858_v14 = vadd.f32 %v1857_v56, %v1834_v59 }
 0x7a3   :  { %2322 = vrcp.f32 %v1858_v14 }
 0x7a8   :  { %v1836_v4 = vpop.f32.mrf.mxu0  ;;  %v1859_v46 = vpop.f32.mrf.mxu1 }
 0x7a9   :  { %v2323_v30 = vpop.eup %2322 }
 0x7aa   :  { %v1916_v61 = vmul.f32 %v2323_v30, %v1915_v15 }
 0x7ac   :  { %v1918_v24 = vperm.slane %v1916_v61, 0 }
 0x7ae   :  { %v1920_v12 = vmul.f32 %v1918_v24, %v1848_v8  ;;  %v1922_v41 = vmul.f32 %v1918_v24, %v1850_v5  ;;  %v1924_v17 = vmul.f32 %v1918_v24, %v1853_v49  ;;  %v1926_v9 = vmul.f32 %v1918_v24, %v1855_v2 }
 0x7b0   :  { %v1928_v28 = vadd.f32 %v2335_v54, %v1920_v12  ;;  %v1930_v6 = vadd.f32 %v2336_v13, %v1922_v41  ;;  %v1932_v3 = vadd.f32 %v2337_v21, %v1924_v17  ;;  %v1870_v11 = vpop.f32.mrf.mxu0  ;;  %v1893_v63 = vpop.f32.mrf.mxu1  ;;  %v1934_v45 = vadd.f32 %v2338_v40, %v1926_v9 }
 0x7b1   :  { %v1894_v29 = vadd.f32 %v1893_v63, %v1870_v11 }
 0x7b2   :  { %2049 = vst [vmem:[%s3469_s6 + $0x40] sm:$0xff] %v1928_v28 }
 0x7b3   :  { %2051 = vst [vmem:[%s3469_s6 + $0x50] sm:$0xff] %v1930_v6 }
 0x7b4   :  { %2053 = vst [vmem:[%s3469_s6 + $0x60] sm:$0xff] %v1932_v3 }
 0x7b5   :  { %2055 = vst [vmem:[%s3469_s6 + $0x70] sm:$0xff] %v1934_v45 }
 0x7b8   :  { %v1872_v20 = vpop.f32.mrf.mxu0  ;;  %v1895_v50 = vpop.f32.mrf.mxu1 }
 0x7b9   :  { %v1896_v33 = vadd.f32 %v1895_v50, %v1872_v20 }
 0x7bc   :  { %v2339_v35 = vld [vmem:[%s3463_s0 + $0x48] sm:$0xff]  ;;  %v2340_v39 = vld [vmem:[%s3463_s0 + $0x58] sm:$0xff] }
 0x7bd   :  { %v2341_v18 = vld [vmem:[%s3463_s0 + $0x68] sm:$0xff]  ;;  %v2342_v22 = vld [vmem:[%s3463_s0 + $0x78] sm:$0xff] }
 0x7c0   :  { %v1875_v31 = vpop.f32.mrf.mxu0  ;;  %v1898_v25 = vpop.f32.mrf.mxu1 }
 0x7c1   :  { %v1899_v48 = vadd.f32 %v1898_v25, %v1875_v31 }
 0x7c8   :  { %v1877_v16 = vpop.f32.mrf.mxu0  ;;  %v1900_v57 = vpop.f32.mrf.mxu1 }
 0x7c9   :  { %v1901_v32 = vadd.f32 %v1900_v57, %v1877_v16 }
 0x7d0   :  { %v1880_v1 = vpop.f32.mrf.mxu0  ;;  %v1903_v52 = vpop.f32.mrf.mxu1 }
 0x7d1   :  { %v1904_v27 = vadd.f32 %v1903_v52, %v1880_v1 }
 0x7d3   :  { %2324 = vrcp.f32 %v1904_v27 }
 0x7d8   :  { %v1882_v34 = vpop.f32.mrf.mxu0  ;;  %v1905_v42 = vpop.f32.mrf.mxu1 }
 0x7d9   :  { %v2325_v53 = vpop.eup %2324 }
 0x7da   :  { %v1917_v60 = vmul.f32 %v2325_v53, %v1915_v15 }
 0x7dc   :  { %v1919_v10 = vperm.slane %v1917_v60, 0 }
 0x7de   :  { %v1921_v51 = vmul.f32 %v1919_v10, %v1894_v29  ;;  %v1923_v58 = vmul.f32 %v1919_v10, %v1896_v33  ;;  %v1925_v23 = vmul.f32 %v1919_v10, %v1899_v48  ;;  %v1927_v19 = vmul.f32 %v1919_v10, %v1901_v32 }
 0x7e0   :  { %v1929_v0 = vadd.f32 %v2339_v35, %v1921_v51  ;;  %v1931_v38 = vadd.f32 %v2340_v39, %v1923_v58  ;;  %v1933_v37 = vadd.f32 %v2341_v18, %v1925_v23  ;;  %v1935_v7 = vadd.f32 %v2342_v22, %v1927_v19 }
 0x7e2   :  { %2050 = vst [vmem:[%s3469_s6 + $0x48] sm:$0xff] %v1929_v0 }
 0x7e3   :  { %2052 = vst [vmem:[%s3469_s6 + $0x58] sm:$0xff] %v1931_v38 }
 0x7e4   :  { %2054 = vst [vmem:[%s3469_s6 + $0x68] sm:$0xff] %v1933_v37 }
 0x7e5   :  { %2056 = vst [vmem:[%s3469_s6 + $0x78] sm:$0xff] %v1935_v7 }

</bundles_post_ra>
